<compile_context>
chip_gen: v7x
topology: tpu7x:2x2x1
jax: 0.10.0
libtpu: 0.0.40
codegen_flags: <defaults>
</compile_context>

<pallas_src>
import functools

import jax
import jax.numpy as jnp
from jax.experimental import pallas as pl
from jax.experimental.pallas import tpu as pltpu


# ----------------------------------------------------------------------------
# Pallas kernel: TB frames per grid step.
#   patches_ref : (TB*HW, Kp)  bf16  im2col patches for TB frames
#   convw_ref   : (Kp, Cp)     bf16  conv3d weight with BN scale folded in
#   bias_ref    : (1, Cp)      f32   fused bias (conv_b * scale + BN shift)
#   fcw_ref     : (Cp, Cp)     bf16  fc weight (in x out)
#   fcb_ref     : (1, Cp)      f32   fc bias
#   out_ref     : (TB, Cp)     f32   output tokens for TB frames
# ----------------------------------------------------------------------------
def encoder_kernel(patches_ref, convw_ref, bias_ref, fcw_ref, fcb_ref, out_ref,
                   *, frames, hw):
    x = patches_ref[...]                                           # (TB*HW, Kp)
    # Conv3d (+ folded BN) as one big matmul on the MXU, f32 accumulation.
    y = jnp.dot(x, convw_ref[...],
                preferred_element_type=jnp.float32)                # (TB*HW, Cp)
    y = jnp.maximum(y + bias_ref[...], 0.0)                        # bias + ReLU
    cp = y.shape[-1]
    # AdaptiveAvgPool3d((None, 1, 1)): per-frame spatial mean over HW.
    pooled = jnp.mean(y.reshape(frames, hw, cp), axis=1)           # (TB, Cp)
    # nn.Linear(feature_dim, feature_dim) on the whole pooled block (bf16 MXU).
    out_ref[...] = (jnp.dot(pooled.astype(jnp.bfloat16), fcw_ref[...],
                            preferred_element_type=jnp.float32)
                    + fcb_ref[...])


# ----------------------------------------------------------------------------
# Wrapper: im2col + parameter folding (glue), hot path in the Pallas kernel.
# ----------------------------------------------------------------------------
def video_encoder_forward(video, params, *, eps=1e-5, frames_per_step=None):
    B, T, C_in, H, W = video.shape
    C = params["conv_w"].shape[0]          # feature_dim
    K = C_in * 27                          # 3*3*3 taps * C_in
    Kp = -(-K // 128) * 128                # lane-pad K up to a multiple of 128
    Cp = -(-C // 128) * 128                # lane-pad feature_dim as well
    HW = H * W
    BT = B * T

    # Coarsened grid: TB frames per step; keep >= 2 steps for v7x's 2 TCs, but
    # the output block's second-to-last dim (TB) must stay a multiple of 8.
    if frames_per_step is not None:
        TB = frames_per_step
    elif BT % 16 == 0:
        TB = BT // 2
    else:
        TB = BT
    assert BT % TB == 0, (BT, TB)
    assert TB % 8 == 0 or TB == BT, (TB, BT)

    # video.transpose(1, 2): (B, T, 3, H, W) -> (B, 3, T, H, W)  (NCDHW)
    x = jnp.transpose(video, (0, 2, 1, 3, 4)).astype(jnp.float32)
    x_pad = jnp.pad(x, ((0, 0), (0, 0), (1, 1), (1, 1), (1, 1)))

    # im2col: tap order (c_in, kt, kh, kw) to match the flattened conv weight.
    cols = []
    for kt in range(3):
        for kh in range(3):
            for kw in range(3):
                cols.append(x_pad[:, :, kt:kt + T, kh:kh + H, kw:kw + W])
    col = jnp.stack(cols, axis=2)                      # (B, C_in, 27, T, H, W)
    col = col.reshape(B, K, T, H, W)
    col = jnp.transpose(col, (0, 2, 3, 4, 1))          # (B, T, H, W, K)
    patches = col.reshape(BT * HW, K)
    patches = jnp.pad(patches, ((0, 0), (0, Kp - K))).astype(jnp.bfloat16)

    # Fold BatchNorm3d (eval) into the conv weight and a single fused bias.
    scale = params["bn_gamma"] / jnp.sqrt(params["bn_var"] + eps)      # (C,)
    shift = params["bn_beta"] - params["bn_mean"] * scale              # (C,)
    conv_w = params["conv_w"].reshape(C, K)                            # (C, K)
    w_fused = (conv_w * scale[:, None]).T                              # (K, C)
    w_fused = jnp.pad(w_fused, ((0, Kp - K), (0, Cp - C))).astype(jnp.bfloat16)
    bias_fused = jnp.pad((params["conv_b"] * scale + shift),
                         (0, Cp - C)).reshape(1, Cp)                   # f32

    # nn.Linear stores weight as (out, in); kernel uses (in, out), lane-padded.
    fc_w = jnp.pad(params["fc_w"].T, ((0, Cp - C), (0, Cp - C))).astype(jnp.bfloat16)
    fc_b = jnp.pad(params["fc_b"], (0, Cp - C)).reshape(1, Cp)         # f32

    kernel = functools.partial(encoder_kernel, frames=TB, hw=HW)

    out = pl.pallas_call(
        kernel,
        out_shape=jax.ShapeDtypeStruct((BT, Cp), jnp.float32),
        grid=(BT // TB,),
        in_specs=[
            pl.BlockSpec((TB * HW, Kp), lambda i: (i, 0)),   # patches tile
            pl.BlockSpec((Kp, Cp), lambda i: (0, 0)),        # fused conv weight
            pl.BlockSpec((1, Cp), lambda i: (0, 0)),         # fused bias
            pl.BlockSpec((Cp, Cp), lambda i: (0, 0)),        # fc weight
            pl.BlockSpec((1, Cp), lambda i: (0, 0)),         # fc bias
        ],
        out_specs=pl.BlockSpec((TB, Cp), lambda i: (i, 0)),
        compiler_params=pltpu.CompilerParams(
            dimension_semantics=("parallel",)),
        # NOTE: block VMEM use here is < 3 MB (patches tile + f32 conv output);
        # at real resolutions re-derive TB against the 32 MiB scoped / 64 MiB
        # physical VMEM on v7x and set vmem_limit_bytes explicitly.
    )(patches, w_fused, bias_fused, fc_w, fc_b)

    return out[:, :C].reshape(B, T, C)


# ----------------------------------------------------------------------------
# Pure-JAX reference (for correctness check against the Pallas kernel).
# ----------------------------------------------------------------------------
def video_encoder_reference(video, params, *, eps=1e-5):
    x = jnp.transpose(video, (0, 2, 1, 3, 4)).astype(jnp.float32)   # NCDHW
    y = jax.lax.conv_general_dilated(
        x, params["conv_w"],
        window_strides=(1, 1, 1),
        padding=((1, 1), (1, 1), (1, 1)),
        dimension_numbers=("NCDHW", "OIDHW", "NCDHW"))
    y = y + params["conv_b"][None, :, None, None, None]
    scale = params["bn_gamma"] / jnp.sqrt(params["bn_var"] + eps)
    shift = params["bn_beta"] - params["bn_mean"] * scale
    y = y * scale[None, :, None, None, None] + shift[None, :, None, None, None]
    y = jnp.maximum(y, 0.0)
    y = jnp.mean(y, axis=(3, 4))                                    # (B, C, T)
    y = jnp.transpose(y, (0, 2, 1))                                 # (B, T, C)
    return y @ params["fc_w"].T + params["fc_b"]


def init_params(key, feature_dim=128, in_channels=3):
    ks = jax.random.split(key, 8)
    C = feature_dim
    return {
        "conv_w": 0.1 * jax.random.normal(ks[0], (C, in_channels, 3, 3, 3), jnp.float32),
        "conv_b": 0.1 * jax.random.normal(ks[1], (C,), jnp.float32),
        "bn_gamma": 1.0 + 0.1 * jax.random.normal(ks[2], (C,), jnp.float32),
        "bn_beta": 0.1 * jax.random.normal(ks[3], (C,), jnp.float32),
        "bn_mean": 0.1 * jax.random.normal(ks[4], (C,), jnp.float32),
        "bn_var": 0.5 + jax.random.uniform(ks[5], (C,), jnp.float32),
        "fc_w": 0.1 * jax.random.normal(ks[6], (C, C), jnp.float32),
        "fc_b": 0.1 * jax.random.normal(ks[7], (C,), jnp.float32),
    }


if __name__ == "__main__":
    key = jax.random.PRNGKey(0)
    k_v, k_p = jax.random.split(key)

    # feature_dim=128 matches the module default and keeps every matmul operand
    # and the output block lane-dense (last dim a multiple of 128).
    B, T, C_in, IMG, FEAT = 2, 8, 3, 16, 128
    video = jax.random.normal(k_v, (B, T, C_in, IMG, IMG), jnp.float32)
    params = init_params(k_p, feature_dim=FEAT, in_channels=C_in)

    out = jax.block_until_ready(video_encoder_forward(video, params))
    ref = jax.block_until_ready(video_encoder_reference(video, params))

    assert out.shape == (B, T, FEAT), out.shape
    # bf16 matmul operands with f32 accumulation -> looser tolerance than pure f32.
    max_err = float(jnp.max(jnp.abs(out - ref)))
    assert jnp.allclose(out, ref, atol=3e-2, rtol=3e-2), max_err
    print("KERNEL_OK")
</pallas_src>

<mosaic_0001>
module attributes {stable_mosaic.version = 11 : i64} {
  func.func @encoder_kernel(%arg0: i32, %arg1: memref<2048x128xbf16, #tpu.memory_space<vmem>>, %arg2: memref<128x128xbf16, #tpu.memory_space<vmem>>, %arg3: memref<1x128xf32, #tpu.memory_space<vmem>>, %arg4: memref<128x128xbf16, #tpu.memory_space<vmem>>, %arg5: memref<1x128xf32, #tpu.memory_space<vmem>>, %arg6: memref<8x128xf32, #tpu.memory_space<vmem>>) attributes {dimension_semantics = [#tpu.dimension_semantics<parallel>], iteration_bounds = array<i64: 2>, scalar_prefetch = 0 : i64, scratch_operands = 0 : i64, tpu.core_type = #tpu.core_type<tc>, window_params = [{transform_indices = @transform_0, window_bounds = array<i64: 2048, 128>}, {pipeline_mode = #tpu.pipeline_mode<synchronous>, transform_indices = @transform_1, window_bounds = array<i64: 128, 128>}, {pipeline_mode = #tpu.pipeline_mode<synchronous>, transform_indices = @transform_2, window_bounds = array<i64: 1, 128>}, {pipeline_mode = #tpu.pipeline_mode<synchronous>, transform_indices = @transform_3, window_bounds = array<i64: 128, 128>}, {pipeline_mode = #tpu.pipeline_mode<synchronous>, transform_indices = @transform_4, window_bounds = array<i64: 1, 128>}, {transform_indices = @transform_5, window_bounds = array<i64: 8, 128>}]} {
    %c0 = arith.constant 0 : index
    %c0_0 = arith.constant 0 : index
    %0 = vector.load %arg1[%c0, %c0_0] : memref<2048x128xbf16, #tpu.memory_space<vmem>>, vector<2048x128xbf16>
    %c0_1 = arith.constant 0 : index
    %c0_2 = arith.constant 0 : index
    %1 = vector.load %arg2[%c0_1, %c0_2] : memref<128x128xbf16, #tpu.memory_space<vmem>>, vector<128x128xbf16>
    %cst = arith.constant dense<0.000000e+00> : vector<2048x128xf32>
    %2 = tpu.matmul %0, %1, %cst {dimension_numbers = #tpu.dot_dimension_numbers<[1], [0], [0], [1], [0, 0, 1, 1], [], []>} : vector<2048x128xbf16>, vector<128x128xbf16>, vector<2048x128xf32> -> vector<2048x128xf32>
    %c0_3 = arith.constant 0 : index
    %c0_4 = arith.constant 0 : index
    %3 = vector.load %arg3[%c0_3, %c0_4] : memref<1x128xf32, #tpu.memory_space<vmem>>, vector<1x128xf32>
    %4 = vector.broadcast %3 : vector<1x128xf32> to vector<2048x128xf32>
    %5 = arith.addf %2, %4 : vector<2048x128xf32>
    %cst_5 = arith.constant 0.000000e+00 : f32
    %6 = vector.broadcast %cst_5 : f32 to vector<2048x128xf32>
    %7 = arith.maximumf %5, %6 : vector<2048x128xf32>
    %8 = vector.shape_cast %7 : vector<2048x128xf32> to vector<8x256x128xf32>
    %cst_6 = arith.constant dense<0.000000e+00> : vector<8x128xf32>
    %9 = vector.multi_reduction <add>, %8, %cst_6 [1] : vector<8x256x128xf32> to vector<8x128xf32>
    %cst_7 = arith.constant 2.560000e+02 : f32
    %10 = vector.broadcast %cst_7 : f32 to vector<8x128xf32>
    %11 = arith.divf %9, %10 : vector<8x128xf32>
    %12 = arith.truncf %11 : vector<8x128xf32> to vector<8x128xbf16>
    %c0_8 = arith.constant 0 : index
    %c0_9 = arith.constant 0 : index
    %13 = vector.load %arg4[%c0_8, %c0_9] : memref<128x128xbf16, #tpu.memory_space<vmem>>, vector<128x128xbf16>
    %cst_10 = arith.constant dense<0.000000e+00> : vector<8x128xf32>
    %14 = tpu.matmul %12, %13, %cst_10 {dimension_numbers = #tpu.dot_dimension_numbers<[1], [0], [0], [1], [0, 0, 1, 1], [], []>} : vector<8x128xbf16>, vector<128x128xbf16>, vector<8x128xf32> -> vector<8x128xf32>
    %c0_11 = arith.constant 0 : index
    %c0_12 = arith.constant 0 : index
    %15 = vector.load %arg5[%c0_11, %c0_12] : memref<1x128xf32, #tpu.memory_space<vmem>>, vector<1x128xf32>
    %16 = vector.broadcast %15 : vector<1x128xf32> to vector<8x128xf32>
    %17 = arith.addf %14, %16 : vector<8x128xf32>
    %c0_13 = arith.constant 0 : index
    %c0_14 = arith.constant 0 : index
    %18 = vector.load %arg6[%c0_13, %c0_14] : memref<8x128xf32, #tpu.memory_space<vmem>>, vector<8x128xf32>
    tpu.vector_store %arg6[%c0_13, %c0_14], %17 {strides = array<i32>} : memref<8x128xf32, #tpu.memory_space<vmem>>, vector<8x128xf32>,
    return
  }
  func.func @transform_0(%arg0: i32) -> (i32, i32) {
    %c0_i32 = arith.constant 0 : i32
    %c0_i32_0 = arith.constant 0 : i32
    return %arg0, %c0_i32 : i32, i32
  }
  func.func @transform_1(%arg0: i32) -> (i32, i32) {
    %c0_i32 = arith.constant 0 : i32
    %c0_i32_0 = arith.constant 0 : i32
    %c0_i32_1 = arith.constant 0 : i32
    return %c0_i32, %c0_i32_0 : i32, i32
  }
  func.func @transform_2(%arg0: i32) -> (i32, i32) {
    %c0_i32 = arith.constant 0 : i32
    %c0_i32_0 = arith.constant 0 : i32
    %c0_i32_1 = arith.constant 0 : i32
    return %c0_i32, %c0_i32_0 : i32, i32
  }
  func.func @transform_3(%arg0: i32) -> (i32, i32) {
    %c0_i32 = arith.constant 0 : i32
    %c0_i32_0 = arith.constant 0 : i32
    %c0_i32_1 = arith.constant 0 : i32
    return %c0_i32, %c0_i32_0 : i32, i32
  }
  func.func @transform_4(%arg0: i32) -> (i32, i32) {
    %c0_i32 = arith.constant 0 : i32
    %c0_i32_0 = arith.constant 0 : i32
    %c0_i32_1 = arith.constant 0 : i32
    return %c0_i32, %c0_i32_0 : i32, i32
  }
  func.func @transform_5(%arg0: i32) -> (i32, i32) {
    %c0_i32 = arith.constant 0 : i32
    %c0_i32_0 = arith.constant 0 : i32
    return %arg0, %c0_i32 : i32, i32
  }
}

</mosaic_0001>

<bundles_post_ra>
// kernel: tpu_custom_call.1
= control target key start
LH: loop header
LB: loop body
LE: loop exit
PB: predicated region body
PF: predicated region fallthrough
CT: control target
= control target key end

     0   :  { %10 = vsyncpa [#allocation3], 0  ;;  %s5037_s0 = inlined_call_operand.hbm [shape: bf16[4096,128], index: 0, kind: input, shape index: {}]   ;;  %s5038_s1 = inlined_call_operand.hbm [shape: bf16[128,128], index: 1, kind: input, shape index: {}]   ;;  %s5039_s2 = inlined_call_operand.vmem [shape: f32[1,128], index: 2, kind: input, shape index: {}]   ;;  %s5040_s3 = inlined_call_operand.hbm [shape: bf16[128,128], index: 3, kind: input, shape index: {}]   ;;  %s5041_s4 = inlined_call_operand.vmem [shape: f32[1,128], index: 4, kind: input, shape index: {}]   ;;  %s5042_s5 = inlined_call_operand.hbm [shape: f32[16,128], index: 5, kind: output, shape index: {}]  }
   0x1   :  { %12 = vsyncpa [#allocation3 + $0x1], 0 }
   0x2   :  { %13 = vsyncpa [#allocation6], 0 }
   0x3   :  { %14 = vsyncpa [#allocation4], 0 }
   0x4   :  { %16 = vsyncpa [#allocation4 + $0x1], 0  ;;  %s4272_s18 = smov 0   ;;  %s4274_s19 = smov 0  }
   0x5   :  { %s4276_s20 = smov 0   ;;  %s4278_s21 = smov 0  }
   0x6 LB: > { %s4293_s22 = sadd.s32 4294967295, %s4232_s21   ;;  %s3242_s23 = sadd.s32 4294967294, %s4232_s21   ;;  %s4232_s21 = sphi %s4278_s21, %s5062_s21   ;;  %s4228_s20 = sphi %s4276_s20, %s5061_s20   ;;  %s4224_s19 = sphi %s4274_s19, %s5060_s19   ;;  %s4220_s18 = sphi %s4272_s18, %s5059_s18  }
   0x7   : > { %p42_p0 = scmp.ne.s32.totalorder %s4224_s19, %s4220_s18  ;;  %p5043_p1 = scmp.eq.s32.totalorder %s4293_s22, 0 }
   0x8   : > { %p156_p3 = scmp.eq.s32.totalorder %s3242_s23, 1  ;;  %p3243_p5 = scmp.ge.s32.totalorder %s4232_s21, 1 }
   0x9   : > { %p4302_p4 = por %p5043_p1, %p42_p0  ;;  %p163_p7 = scmp.lt.s32.totalorder %s4232_s21, 3 }
   0xa   : > { %p4307_p6 = por %p156_p3, %p42_p0  ;;  %s4234_s27 = smov [#allocation5]  }
   0xb   : > { %s5046_s24 = scalar_select %p4302_p4, 1, 0 }
   0xc   : > { %s5047_s25 = scalar_select %p4307_p6, 1, 0 }
   0xd   : > { %p4312_p8 = pnand %p3243_p5, %p163_p7  ;;  %s175_s28 = sshll.u32 %s4234_s27, 4  ;;  %s4316_s28 = int_to_ptr.vmem [resolvable:$true] %s175_s28 }
   0xe   : > { %s4235_s30 = smov [#allocation7]   ;;  %s4076_s9 = scalar_lea.hbm %s5038_s1, 1024 }
   0xf   : > { %p3871_p9 = pneg %p4312_p8  ;;  %s191_s6 = sshll.u32 %s4235_s30, 4  ;;  %s4327_s6 = int_to_ptr.vmem [resolvable:$true] %s191_s6 }
  0x10   : > { %p4077_p12 = scmp.ne.s32.totalorder %s5038_s1, %s4076_s9  ;;  %p4083_p5 = scmp.lt.u32.totalorder %s4076_s9, %s5038_s1 }
  0x11   : > { %p4323_p11 = pnand %p3871_p9, %p5043_p1 }
  0x13   : > { %p4078_p13 = pneg %p4323_p11 }
  0x15   : > { %p4079_p0 = pnand %p4078_p13, %p4077_p12 }
  0x17   : > { %p4080_p3 = pneg %p4079_p0 }
  0x19   : > { %p4085_p7 = pnand %p4083_p5, %p4080_p3 }
  0x1b   : > { %4088 = shalt.err (!%p4085_p7)
}
  0x1c   : > { %s4089_s14 = scalar_lea.vmem %s4316_s28, 1024  ;;  %p4097_p2 = scmp.lt.s32.totalorder %s4316_s28, %s4316_s28 }
  0x1d   : > { %p4090_p9 = scmp.ne.s32.totalorder %s4316_s28, %s4089_s14  ;;  %p4098_p12 = scmp.lt.s32.totalorder %s4089_s14, %s4089_s14 }
  0x1f   : > { %p4092_p10 = pnand %p4090_p9, %p4078_p13  ;;  %p4099_p0 = por %p4098_p12, %p4097_p2 }
  0x21   : > { %p4093_p1 = pneg %p4092_p10 }
  0x23   : > { %p4100_p6 = pnand %p4099_p0, %p4093_p1 }
  0x25   : > { %4103 = shalt.err (!%p4100_p6)
}
  0x26   : > { %s4236_s15 = smov 64   ;;  %s4237_s16 = smov 4  }
  0x27   : > { %3874 = dma.hbm_to_vmem [thread:$0]  (!%p4323_p11), %s5038_s1, 1024, %s4316_s28, [#allocation6], %s4236_s15, %s4236_s15, %s4237_s16  }
  0x28   : > { %s4104_s7 = scalar_lea.hbm %s5040_s3, 1024 }
  0x29   : > { %p4105_p1 = scmp.ne.s32.totalorder %s5040_s3, %s4104_s7  ;;  %p4111_p10 = scmp.lt.u32.totalorder %s4104_s7, %s5040_s3 }
  0x2b   : > { %p4107_p2 = pnand %p4105_p1, %p4078_p13 }
  0x2d   : > { %p4108_p6 = pneg %p4107_p2 }
  0x2f   : > { %p4113_p3 = pnand %p4111_p10, %p4108_p6 }
  0x31   : > { %4116 = shalt.err (!%p4113_p3)
}
  0x32   : > { %s4117_s28 = scalar_lea.vmem %s4327_s6, 1024  ;;  %p4125_p12 = scmp.lt.s32.totalorder %s4327_s6, %s4327_s6 }
  0x33   : > { %p4118_p5 = scmp.ne.s32.totalorder %s4327_s6, %s4117_s28  ;;  %p4126_p0 = scmp.lt.s32.totalorder %s4117_s28, %s4117_s28 }
  0x35   : > { %p4120_p7 = pnand %p4118_p5, %p4078_p13  ;;  %p4127_p1 = por %p4126_p0, %p4125_p12 }
  0x37   : > { %p4121_p9 = pneg %p4120_p7 }
  0x39   : > { %p4128_p2 = pnand %p4127_p1, %p4121_p9 }
  0x3b   : > { %4131 = shalt.err (!%p4128_p2)
}
  0x3c   : > { %3877 = dma.hbm_to_vmem [thread:$0]  (!%p4323_p11), %s5040_s3, 1024, %s4327_s6, [#allocation6], %s4236_s15, %s4236_s15, %s4237_s16  }
  0x3d   : > { %s4388_s29 = sadd.s32 1, %s4232_s21   ;;  %s29_s14 = sadd.s32 1, %s4228_s20 }
  0x3e   : > { %s26_s17 = ssub.s32 %s4232_s21, %s4388_s29  ;;  %p36_p13 = scmp.ne.s32.totalorder %s4228_s20, %s4224_s19 }
  0x3f   : > { %p27_p6 = scmp.eq.s32.totalorder %s26_s17, 0  ;;  %p37_p10 = scmp.eq.s32.totalorder %s4232_s21, 0 }
  0x40   : > { %p5050_p3 = scmp.eq.s32.totalorder %s4293_s22, 1  ;;  %p3888_p7 = scmp.lt.s32.totalorder %s4232_s21, 2 }
  0x41   : > { %s4404_s27 = scalar_select %p27_p6, %s4228_s20, %s29_s14  }
  0x42   : > { %p4398_p5 = por %p5050_p3, %p36_p13  ;;  %p38_p9 = por %p37_p10, %p36_p13 }
  0x43   : > { %s208_s30 = sand.u32 1, %s4228_s20   ;;  %s3405_s6 = sshll.u32 %s4232_s21, 14 }
  0x44   : > { %s5051_s23 = scalar_select %p4398_p5, 1, 0 }
  0x45   : > { %s3247_s7 = sshll.u32 %s208_s30, 10  ;;  %s4411_s10 = scalar_lea.hbm %s5037_s0, %s3405_s6 }
  0x46   : > { %s212_s11 = scalar_lea.vmem [#allocation2], %s3247_s7  ;;  %p4415_p11 = pnand %p3888_p7, %p38_p9 }
  0x47   : > { %s219_s28 = sshll.u32 %s212_s11, 4  ;;  %s4419_s13 = scalar_lea.sflag [#allocation3], %s208_s30  ;;  %s4413_s28 = int_to_ptr.vmem [resolvable:$true] %s219_s28 }
  0x48   : > { %s4132_s14 = scalar_lea.hbm %s4411_s10, 16384  ;;  %p4134_p0 = pneg %p4415_p11 }
  0x49   : > { %p4133_p12 = scmp.ne.s32.totalorder %s4411_s10, %s4132_s14  ;;  %s4137_s6 = scalar_lea.hbm %s5037_s0, 32768 }
  0x4a   : > { %p4138_p13 = scmp.lt.u32.totalorder %s4411_s10, %s5037_s0  ;;  %p4139_p6 = scmp.lt.u32.totalorder %s4137_s6, %s4132_s14 }
  0x4b   : > { %p4135_p1 = pnand %p4134_p0, %p4133_p12  ;;  %p4141_p3 = scmp.lt.u32.totalorder %s4132_s14, %s4411_s10 }
  0x4c   : > { %p4140_p10 = por %p4139_p6, %p4138_p13 }
  0x4d   : > { %p4136_p2 = pneg %p4135_p1 }
  0x4e   : > { %p4142_p7 = por %p4141_p3, %p4140_p10 }
  0x50   : > { %p4143_p9 = pnand %p4142_p7, %p4136_p2 }
  0x52   : > { %4146 = shalt.err (!%p4143_p9)
}
  0x53   : > { %s4147_s30 = scalar_lea.vmem %s4413_s28, 16384  ;;  %s4238_s11 = smov [#allocation2]  }
  0x54   : > { %p4148_p12 = scmp.ne.s32.totalorder %s4413_s28, %s4147_s30  ;;  %s4152_s17 = sshll.u32 %s4238_s11, 4  ;;  %s4153_s17 = int_to_ptr.vmem [resolvable:$false] %s4152_s17 }
  0x55   : > { %s4154_s7 = scalar_lea.vmem %s4153_s17, 32768  ;;  %p4155_p4 = scmp.lt.s32.totalorder %s4413_s28, %s4153_s17 }
  0x56   : > { %p4150_p1 = pnand %p4148_p12, %p4134_p0  ;;  %p4156_p13 = scmp.lt.s32.totalorder %s4154_s7, %s4147_s30 }
  0x58   : > { %p4151_p5 = pneg %p4150_p1  ;;  %p4157_p6 = por %p4156_p13, %p4155_p4 }
  0x5a   : > { %p4158_p10 = pnand %p4157_p6, %p4151_p5 }
  0x5c   : > { %4161 = shalt.err (!%p4158_p10)
}
  0x5d   : > { %3881 = dma.hbm_to_vmem [thread:$0]  (!%p4415_p11), %s4411_s10, 16384, %s4413_s28, %s4419_s13, %s4236_s15, %s4236_s15, %s4237_s16  }
  0x5e   : > { %231 = sbr.rel (%p4312_p8) target bundleno = 927 (0x39f), region = 40  ;;  %s4453_s14 = sand.u32 (!%p4312_p8), 1, %s4224_s19  }
  0x5f   : > { %s3251_s6 = sshll.u32 (!%p4312_p8), %s4453_s14, 10  ;;  %s234_s8 = scalar_lea.sflag (!%p4312_p8), [#allocation3], %s4453_s14 }
  0x60   : > { %s4457_s9 = scalar_lea.vmem (!%p4312_p8), [#allocation2], %s3251_s6  ;;  %p5053_p4 = scmp.ne.s32.totalorder (!%p4312_p8), %s5046_s24, 0 }
  0x65   : > { %4207 = dma.done.wait (%p5053_p4), %s234_s8, 16384  }
  0x66   : > { %4209 = vsyncadd (%p5053_p4), %s234_s8, 4294950912  ;;  %p5054_p5 = scmp.eq.s32.totalorder %s4293_s22, 0 }
  0x68   : > { %4211 = dma.done.wait (%p5054_p5), [#allocation6], 2048   ;;  %p5055_p8 = pmov %p5054_p5 }
  0x69   : > { %v3930_v0 = vld [vmem:[#allocation5] sm:$0xff]   ;;  %v3931_v1 = vld [vmem:[#allocation5 + $0x8] sm:$0xff]   ;;  %v3932_v2 = vld [vmem:[#allocation5 + $0x10] sm:$0xff]   ;;  %vm3034_vm0 = vcmask 1041409   ;;  %vm4240_vm1 = vmmov 0   ;;  %vm3036_vm2 = vcmask 1042434  }
  0x6a   : > { %4213 = vsyncadd (%p5055_p8), [#allocation6], 4294965248  ;;  %3551 = vmatprep.subr.bf16.mxu0 %v3930_v0  ;;  %3843 = vmatprep.subr.bf16.mxu1 %v3930_v0  ;;  %v3933_v3 = vld [vmem:[#allocation5 + $0x18] sm:$0xff]   ;;  %v3938_v4 = vld [vmem:[%s4457_s9] sm:$0xff]   ;;  %vm3038_vm3 = vcmask 1043459   ;;  %vm3040_vm4 = vcmask 1044484  }
  0x6b   : > { %3552 = vmatpush3.bf16.msra.mxu0 %v3930_v0  ;;  %3851 = vmatpush3.bf16.msra.mxu1 %v3930_v0  ;;  %v3934_v5 = vld [vmem:[#allocation5 + $0x20] sm:$0xff]   ;;  %v3935_v6 = vld [vmem:[#allocation5 + $0x28] sm:$0xff]   ;;  %v3936_v7 = vld [vmem:[#allocation5 + $0x30] sm:$0xff]   ;;  %vm3042_vm5 = vcmask 1045509   ;;  %vm3044_vm6 = vcmask 1046534   ;;  %vm3046_vm7 = vcmask 1047559  }
  0x6c   : > { %3553 = vmatprep.subr.bf16.mxu0 %v3931_v1  ;;  %3844 = vmatprep.subr.bf16.mxu1 %v3931_v1  ;;  %v3937_v8 = vld [vmem:[#allocation5 + $0x38] sm:$0xff]   ;;  %v3954_v9 = vld [vmem:[%s4457_s9 + $0x210] sm:$0xff]   ;;  %v3939_v10 = vld [vmem:[%s4457_s9 + $0x8] sm:$0xff]   ;;  %s3254_s12 = sshll.u32 %s4453_s14, 3  ;;  %s3402_s11 = sshll.u32 %s4293_s22, 7 }
  0x6d   : > { %3567 = vmatprep.mubr.bf16.mxu0 %v3938_v4  ;;  %3699 = vmatprep.mubr.bf16.mxu1 %v3954_v9  ;;  %v3940_v11 = vld [vmem:[%s4457_s9 + $0x10] sm:$0xff]   ;;  %v3955_v12 = vld [vmem:[%s4457_s9 + $0x218] sm:$0xff]   ;;  %v3958_v13 = vld [vmem:[%s4457_s9 + $0x220] sm:$0xff]   ;;  %s271_s17 = scalar_lea.vmem [#allocation8], %s3254_s12  ;;  %s3140_s24 = scalar_lea.sflag [#allocation4], %s4453_s14 }
  0x6e   : > { %v3941_v14 = vld [vmem:[%s4457_s9 + $0x18] sm:$0xff]   ;;  %v3942_v15 = vld [vmem:[%s4457_s9 + $0x20] sm:$0xff]   ;;  %v3959_v16 = vld [vmem:[%s4457_s9 + $0x228] sm:$0xff]   ;;  %s3153_s7 = sshll.u32 %s271_s17, 4  ;;  %p5056_p0 = scmp.ne.s32.totalorder %s5051_s23, 0  ;;  %s4995_s7 = int_to_ptr.vmem [resolvable:$true] %s3153_s7 }
  0x6f   : > { %3554 = vmatpush3.bf16.msra.mxu0 %v3931_v1  ;;  %3852 = vmatpush3.bf16.msra.mxu1 %v3931_v1  ;;  %v3962_v17 = vld [vmem:[%s4457_s9 + $0x230] sm:$0xff]   ;;  %v3943_v18 = vld [vmem:[%s4457_s9 + $0x28] sm:$0xff]   ;;  %v3963_v20 = vld [vmem:[%s4457_s9 + $0x238] sm:$0xff]   ;;  %s4162_s22 = scalar_lea.vmem %s4995_s7, 128  ;;  %s4241_s26 = smov [#allocation8]  }
  0x70   : > { %3555 = vmatprep.subr.bf16.mxu0 %v3932_v2  ;;  %3845 = vmatprep.subr.bf16.mxu1 %v3932_v2  ;;  %v3944_v19 = vld [vmem:[%s4457_s9 + $0x30] sm:$0xff]   ;;  %v3966_v21 = vld [vmem:[%s4457_s9 + $0x240] sm:$0xff]   ;;  %v3945_v22 = vld [vmem:[%s4457_s9 + $0x38] sm:$0xff]   ;;  %p4163_p11 = scmp.ne.s32.totalorder %s4995_s7, %s4162_s22  ;;  %s4166_s15 = sshll.u32 %s4241_s26, 4  ;;  %s4167_s15 = int_to_ptr.vmem [resolvable:$false] %s4166_s15 }
  0x71   : > { %v3946_v23 = vld [vmem:[%s4457_s9 + $0x40] sm:$0xff]   ;;  %v3967_v24 = vld [vmem:[%s4457_s9 + $0x248] sm:$0xff]   ;;  %v3970_v25 = vld [vmem:[%s4457_s9 + $0x250] sm:$0xff]   ;;  %s4168_s16 = scalar_lea.vmem %s4167_s15, 256  ;;  %p4169_p7 = scmp.lt.s32.totalorder %s4995_s7, %s4167_s15 }
  0x72   : > { %v3947_v26 = vld [vmem:[%s4457_s9 + $0x48] sm:$0xff]   ;;  %v3948_v27 = vld [vmem:[%s4457_s9 + $0x50] sm:$0xff]   ;;  %v3971_v28 = vld [vmem:[%s4457_s9 + $0x258] sm:$0xff]   ;;  %p4164_p2 = pnand %p4163_p11, %p5056_p0  ;;  %p4170_p9 = scmp.lt.s32.totalorder %s4168_s16, %s4162_s22 }
  0x73   : > { %3556 = vmatpush3.bf16.msra.mxu0 %v3932_v2  ;;  %3853 = vmatpush3.bf16.msra.mxu1 %v3932_v2  ;;  %v3974_v29 = vld [vmem:[%s4457_s9 + $0x260] sm:$0xff]   ;;  %v3949_v30 = vld [vmem:[%s4457_s9 + $0x58] sm:$0xff]   ;;  %v3975_v32 = vld [vmem:[%s4457_s9 + $0x268] sm:$0xff]  }
  0x74   : > { %3557 = vmatprep.subr.bf16.mxu0 %v3933_v3  ;;  %3846 = vmatprep.subr.bf16.mxu1 %v3933_v3  ;;  %v3950_v31 = vld [vmem:[%s4457_s9 + $0x60] sm:$0xff]   ;;  %v3978_v33 = vld [vmem:[%s4457_s9 + $0x270] sm:$0xff]   ;;  %v3951_v34 = vld [vmem:[%s4457_s9 + $0x68] sm:$0xff]   ;;  %p4165_p3 = pneg %p4164_p2  ;;  %p4171_p12 = por %p4170_p9, %p4169_p7 }
  0x75   : > { %v3952_v35 = vld [vmem:[%s4457_s9 + $0x70] sm:$0xff]   ;;  %v3979_v36 = vld [vmem:[%s4457_s9 + $0x278] sm:$0xff]   ;;  %v3982_v37 = vld [vmem:[%s4457_s9 + $0x280] sm:$0xff]  }
  0x76   : > { %v3953_v38 = vld [vmem:[%s4457_s9 + $0x78] sm:$0xff]   ;;  %v3956_v39 = vld [vmem:[%s4457_s9 + $0x80] sm:$0xff]   ;;  %v3983_v40 = vld [vmem:[%s4457_s9 + $0x288] sm:$0xff]   ;;  %p4172_p1 = pnand %p4171_p12, %p4165_p3 }
  0x77   : > { %3558 = vmatpush3.bf16.msra.mxu0 %v3933_v3  ;;  %3854 = vmatpush3.bf16.msra.mxu1 %v3933_v3  ;;  %v3986_v41 = vld [vmem:[%s4457_s9 + $0x290] sm:$0xff]   ;;  %v3957_v42 = vld [vmem:[%s4457_s9 + $0x88] sm:$0xff]   ;;  %v3987_v43 = vld [vmem:[%s4457_s9 + $0x298] sm:$0xff]  }
  0x78   : > { %3559 = vmatprep.subr.bf16.mxu0 %v3934_v5  ;;  %3847 = vmatprep.subr.bf16.mxu1 %v3934_v5  ;;  %v3960_v44 = vld [vmem:[%s4457_s9 + $0x90] sm:$0xff]   ;;  %v3990_v45 = vld [vmem:[%s4457_s9 + $0x2a0] sm:$0xff]   ;;  %v3961_v46 = vld [vmem:[%s4457_s9 + $0x98] sm:$0xff]  }
  0x79   : > { %v3991_v47 = vld [vmem:[%s4457_s9 + $0x2a8] sm:$0xff]   ;;  %v3964_v48 = vld [vmem:[%s4457_s9 + $0xa0] sm:$0xff]   ;;  %v3994_v49 = vld [vmem:[%s4457_s9 + $0x2b0] sm:$0xff]  }
  0x7a   : > { %v3965_v50 = vld [vmem:[%s4457_s9 + $0xa8] sm:$0xff]   ;;  %v3995_v51 = vld [vmem:[%s4457_s9 + $0x2b8] sm:$0xff]   ;;  %v3968_v52 = vld [vmem:[%s4457_s9 + $0xb0] sm:$0xff]  }
  0x7b   : > { %3560 = vmatpush3.bf16.msra.mxu0 %v3934_v5  ;;  %3855 = vmatpush3.bf16.msra.mxu1 %v3934_v5  ;;  %v3998_v53 = vld [vmem:[%s4457_s9 + $0x2c0] sm:$0xff]   ;;  %v3969_v54 = vld [vmem:[%s4457_s9 + $0xb8] sm:$0xff]   ;;  %v3999_v56 = vld [vmem:[%s4457_s9 + $0x2c8] sm:$0xff]  }
  0x7c   : > { %3561 = vmatprep.subr.bf16.mxu0 %v3935_v6  ;;  %3848 = vmatprep.subr.bf16.mxu1 %v3935_v6  ;;  %v3972_v55 = vld [vmem:[%s4457_s9 + $0xc0] sm:$0xff]   ;;  %v4002_v57 = vld [vmem:[%s4457_s9 + $0x2d0] sm:$0xff]   ;;  %v3973_v58 = vld [vmem:[%s4457_s9 + $0xc8] sm:$0xff]  }
  0x7d   : > { %v3976_v59 = vld [vmem:[%s4457_s9 + $0xd0] sm:$0xff]   ;;  %v4003_v60 = vld [vmem:[%s4457_s9 + $0x2d8] sm:$0xff]   ;;  %v4006_v61 = vld [vmem:[%s4457_s9 + $0x2e0] sm:$0xff]  }
  0x7e   : > { %v3977_v62 = vld [vmem:[%s4457_s9 + $0xd8] sm:$0xff]   ;;  %v4007_v63 = vld [vmem:[%s4457_s9 + $0x2e8] sm:$0xff]   ;;  %v3980_v0 = vld [vmem:[%s4457_s9 + $0xe0] sm:$0xff]  }
  0x7f   : > { %3562 = vmatpush3.bf16.msra.mxu0 %v3935_v6  ;;  %3856 = vmatpush3.bf16.msra.mxu1 %v3935_v6  ;;  %v4010_v1 = vld [vmem:[%s4457_s9 + $0x2f0] sm:$0xff]   ;;  %v3981_v2 = vld [vmem:[%s4457_s9 + $0xe8] sm:$0xff]   ;;  %v4011_v3 = vld [vmem:[%s4457_s9 + $0x2f8] sm:$0xff]  }
  0x80   : > { %3563 = vmatprep.subr.bf16.mxu0 %v3936_v7  ;;  %3849 = vmatprep.subr.bf16.mxu1 %v3936_v7  ;;  %v3984_v4 = vld [vmem:[%s4457_s9 + $0xf0] sm:$0xff]   ;;  %v4014_v5 = vld [vmem:[%s4457_s9 + $0x300] sm:$0xff]   ;;  %v3985_v6 = vld [vmem:[%s4457_s9 + $0xf8] sm:$0xff]  }
  0x81   : > { %v4018_v9 = vld [vmem:[%s4457_s9 + $0x310] sm:$0xff]  }
  0x83   : > { %3564 = vmatpush3.bf16.msra.mxu0 %v3936_v7  ;;  %3857 = vmatpush3.bf16.msra.mxu1 %v3936_v7  ;;  %v4015_v7 = vld [vmem:[%s4457_s9 + $0x308] sm:$0xff]  }
  0x84   : > { %3565 = vmatprep.subr.bf16.mxu0 %v3937_v8  ;;  %3850 = vmatprep.subr.bf16.mxu1 %v3937_v8 }
  0x87   : > { %3566 = vmatpush3.bf16.msra.mxu0 %v3937_v8  ;;  %3858 = vmatpush3.bf16.msra.mxu1 %v3937_v8  ;;  %v3988_v8 = vld [vmem:[%s4457_s9 + $0x100] sm:$0xff]  }
  0x8a   : > { %3568 = vmatmul.mubr.bf16.vlgmr.msra.gmra.mrb[0].mxu0 %v3939_v10  ;;  %3700 = vmatmul.mubr.bf16.vlgmr.msra.gmra.mrb[0].mxu1 %v3955_v12  ;;  %v3989_v10 = vld [vmem:[%s4457_s9 + $0x108] sm:$0xff]   ;;  %v3992_v12 = vld [vmem:[%s4457_s9 + $0x110] sm:$0xff]  }
  0x8b   : > { %3571 = vmatprep.mubr.bf16.mxu0 %v3940_v11  ;;  %3703 = vmatprep.mubr.bf16.mxu1 %v3958_v13  ;;  %v4019_v11 = vld [vmem:[%s4457_s9 + $0x318] sm:$0xff]   ;;  %v4022_v13 = vld [vmem:[%s4457_s9 + $0x320] sm:$0xff]  }
  0x92   : > { %3572 = vmatmul.mubr.bf16.gmra.mrb[4].mxu0 %v3941_v14  ;;  %3704 = vmatmul.mubr.bf16.gmra.mrb[4].mxu1 %v3959_v16  ;;  %v3993_v14 = vld [vmem:[%s4457_s9 + $0x118] sm:$0xff]   ;;  %v3996_v16 = vld [vmem:[%s4457_s9 + $0x120] sm:$0xff]  }
  0x93   : > { %3575 = vmatprep.mubr.bf16.mxu0 %v3942_v15  ;;  %3707 = vmatprep.mubr.bf16.mxu1 %v3962_v17  ;;  %v4023_v15 = vld [vmem:[%s4457_s9 + $0x328] sm:$0xff]   ;;  %v4026_v17 = vld [vmem:[%s4457_s9 + $0x330] sm:$0xff]  }
  0x9a   : > { %3576 = vmatmul.mubr.bf16.gmra.mrb[8].mxu0 %v3943_v18  ;;  %3708 = vmatmul.mubr.bf16.gmra.mrb[8].mxu1 %v3963_v20  ;;  %v3997_v18 = vld [vmem:[%s4457_s9 + $0x128] sm:$0xff]   ;;  %v4000_v20 = vld [vmem:[%s4457_s9 + $0x130] sm:$0xff]  }
  0x9b   : > { %3579 = vmatprep.mubr.bf16.mxu0 %v3944_v19  ;;  %3711 = vmatprep.mubr.bf16.mxu1 %v3966_v21  ;;  %v4027_v19 = vld [vmem:[%s4457_s9 + $0x338] sm:$0xff]   ;;  %v4030_v21 = vld [vmem:[%s4457_s9 + $0x340] sm:$0xff]  }
  0xa2   : > { %3580 = vmatmul.mubr.bf16.gmra.mrb[12].mxu0 %v3945_v22  ;;  %3712 = vmatmul.mubr.bf16.gmra.mrb[12].mxu1 %v3967_v24  ;;  %v4001_v22 = vld [vmem:[%s4457_s9 + $0x138] sm:$0xff]   ;;  %v4004_v24 = vld [vmem:[%s4457_s9 + $0x140] sm:$0xff]  }
  0xa3   : > { %3583 = vmatprep.mubr.bf16.mxu0 %v3946_v23  ;;  %3715 = vmatprep.mubr.bf16.mxu1 %v3970_v25  ;;  %v4031_v23 = vld [vmem:[%s4457_s9 + $0x348] sm:$0xff]   ;;  %v4034_v25 = vld [vmem:[%s4457_s9 + $0x350] sm:$0xff]  }
  0xaa   : > { %3584 = vmatmul.mubr.bf16.gmra.mrb[16].mxu0 %v3947_v26  ;;  %3716 = vmatmul.mubr.bf16.gmra.mrb[16].mxu1 %v3971_v28  ;;  %v4005_v26 = vld [vmem:[%s4457_s9 + $0x148] sm:$0xff]   ;;  %v4008_v28 = vld [vmem:[%s4457_s9 + $0x150] sm:$0xff]  }
  0xab   : > { %3587 = vmatprep.mubr.bf16.mxu0 %v3948_v27  ;;  %3719 = vmatprep.mubr.bf16.mxu1 %v3974_v29  ;;  %v4035_v27 = vld [vmem:[%s4457_s9 + $0x358] sm:$0xff]   ;;  %v4038_v29 = vld [vmem:[%s4457_s9 + $0x360] sm:$0xff]  }
  0xb2   : > { %3588 = vmatmul.mubr.bf16.gmra.mrb[20].mxu0 %v3949_v30  ;;  %3720 = vmatmul.mubr.bf16.gmra.mrb[20].mxu1 %v3975_v32  ;;  %v4009_v30 = vld [vmem:[%s4457_s9 + $0x158] sm:$0xff]   ;;  %v4012_v32 = vld [vmem:[%s4457_s9 + $0x160] sm:$0xff]  }
  0xb3   : > { %3591 = vmatprep.mubr.bf16.mxu0 %v3950_v31  ;;  %3723 = vmatprep.mubr.bf16.mxu1 %v3978_v33  ;;  %v4039_v31 = vld [vmem:[%s4457_s9 + $0x368] sm:$0xff]   ;;  %v4042_v33 = vld [vmem:[%s4457_s9 + $0x370] sm:$0xff]  }
  0xba   : > { %3592 = vmatmul.mubr.bf16.gmra.mrb[24].mxu0 %v3951_v34  ;;  %3724 = vmatmul.mubr.bf16.gmra.mrb[24].mxu1 %v3979_v36  ;;  %v4013_v34 = vld [vmem:[%s4457_s9 + $0x168] sm:$0xff]   ;;  %v4016_v36 = vld [vmem:[%s4457_s9 + $0x170] sm:$0xff]  }
  0xbb   : > { %3595 = vmatprep.mubr.bf16.mxu0 %v3952_v35  ;;  %3727 = vmatprep.mubr.bf16.mxu1 %v3982_v37  ;;  %v4043_v35 = vld [vmem:[%s4457_s9 + $0x378] sm:$0xff]   ;;  %v4046_v37 = vld [vmem:[%s4457_s9 + $0x380] sm:$0xff]  }
  0xc2   : > { %3596 = vmatmul.mubr.bf16.gmra.mrb[28].mxu0 %v3953_v38  ;;  %3728 = vmatmul.mubr.bf16.gmra.mrb[28].mxu1 %v3983_v40  ;;  %v4017_v38 = vld [vmem:[%s4457_s9 + $0x178] sm:$0xff]   ;;  %v4020_v40 = vld [vmem:[%s4457_s9 + $0x180] sm:$0xff]  }
  0xc3   : > { %3599 = vmatprep.mubr.bf16.mxu0 %v3956_v39  ;;  %3731 = vmatprep.mubr.bf16.mxu1 %v3986_v41  ;;  %v4047_v39 = vld [vmem:[%s4457_s9 + $0x388] sm:$0xff]   ;;  %v4050_v41 = vld [vmem:[%s4457_s9 + $0x390] sm:$0xff]  }
  0xca   : > { %3600 = vmatmul.mubr.bf16.gmra.mrb[32].mxu0 %v3957_v42  ;;  %3732 = vmatmul.mubr.bf16.gmra.mrb[32].mxu1 %v3987_v43  ;;  %v4021_v42 = vld [vmem:[%s4457_s9 + $0x188] sm:$0xff]   ;;  %v4051_v43 = vld [vmem:[%s4457_s9 + $0x398] sm:$0xff]  }
  0xcb   : > { %3603 = vmatprep.mubr.bf16.mxu0 %v3960_v44  ;;  %3735 = vmatprep.mubr.bf16.mxu1 %v3990_v45  ;;  %v4024_v44 = vld [vmem:[%s4457_s9 + $0x190] sm:$0xff]   ;;  %v4054_v45 = vld [vmem:[%s4457_s9 + $0x3a0] sm:$0xff]  }
  0xd2   : > { %3604 = vmatmul.mubr.bf16.gmra.mrb[36].mxu0 %v3961_v46  ;;  %3736 = vmatmul.mubr.bf16.gmra.mrb[36].mxu1 %v3991_v47  ;;  %v4066_v46 = vld [vmem:[#allocation7] sm:$0xff]   ;;  %v4239_v47 = vmov 0.0  }
  0xd3   : > { %3607 = vmatprep.mubr.bf16.mxu0 %v3964_v48  ;;  %3739 = vmatprep.mubr.bf16.mxu1 %v3994_v49  ;;  %v4025_v48 = vld [vmem:[%s4457_s9 + $0x198] sm:$0xff]   ;;  %v4055_v49 = vld [vmem:[%s4457_s9 + $0x3a8] sm:$0xff]  }
  0xd4   : > { %3823 = vmatprep.subr.bf16.mxu1 %v4239_v47 }
  0xd5   : > { %3824 = vmatpush3.bf16.msra.mxu1 %v4066_v46 }
  0xd6   : > { %3825 = vmatprep.subr.bf16.mxu1 %v4239_v47 }
  0xda   : > { %3608 = vmatmul.mubr.bf16.gmra.mrb[40].mxu0 %v3965_v50  ;;  %3740 = vmatmul.mubr.bf16.gmra.mrb[40].mxu1 %v3995_v51  ;;  %v4028_v50 = vld [vmem:[%s4457_s9 + $0x1a0] sm:$0xff]   ;;  %v4056_v51 = vld [vmem:[%s4457_s9 + $0x3b0] sm:$0xff]  }
  0xdb   : > { %3611 = vmatprep.mubr.bf16.mxu0 %v3968_v52  ;;  %3743 = vmatprep.mubr.bf16.mxu1 %v3998_v53  ;;  %v4029_v52 = vld [vmem:[%s4457_s9 + $0x1a8] sm:$0xff]   ;;  %v4057_v53 = vld [vmem:[%s4457_s9 + $0x3b8] sm:$0xff]  }
  0xe2   : > { %3612 = vmatmul.mubr.bf16.gmra.mrb[44].mxu0 %v3969_v54  ;;  %3744 = vmatmul.mubr.bf16.gmra.mrb[44].mxu1 %v3999_v56  ;;  %v4032_v54 = vld [vmem:[%s4457_s9 + $0x1b0] sm:$0xff]   ;;  %v4582_v56 = vld [vmem:[%s5039_s2] ss:$0 sm:$0xff] }
  0xe3   : > { %3615 = vmatprep.mubr.bf16.mxu0 %v3972_v55  ;;  %3747 = vmatprep.mubr.bf16.mxu1 %v4002_v57  ;;  %v4058_v55 = vld [vmem:[%s4457_s9 + $0x3c0] sm:$0xff]  }
  0xea   : > { %3616 = vmatmul.mubr.bf16.gmra.mrb[48].mxu0 %v3973_v58  ;;  %3748 = vmatmul.mubr.bf16.gmra.mrb[48].mxu1 %v4003_v60  ;;  %v4033_v60 = vld [vmem:[%s4457_s9 + $0x1b8] sm:$0xff]  }
  0xeb   : > { %3619 = vmatprep.mubr.bf16.mxu0 %v3976_v59  ;;  %3751 = vmatprep.mubr.bf16.mxu1 %v4006_v61  ;;  %v4059_v61 = vld [vmem:[%s4457_s9 + $0x3c8] sm:$0xff]  }
  0xf2   : > { %3620 = vmatmul.mubr.bf16.gmra.mrb[52].mxu0 %v3977_v62  ;;  %3752 = vmatmul.mubr.bf16.gmra.mrb[52].mxu1 %v4007_v63 }
  0xf3   : > { %3623 = vmatprep.mubr.bf16.mxu0 %v3980_v0  ;;  %3755 = vmatprep.mubr.bf16.mxu1 %v4010_v1  ;;  %v4036_v1 = vld [vmem:[%s4457_s9 + $0x1c0] sm:$0xff]  }
  0xfa   : > { %3624 = vmatmul.mubr.bf16.gmra.mrb[56].mxu0 %v3981_v2  ;;  %3756 = vmatmul.mubr.bf16.gmra.mrb[56].mxu1 %v4011_v3  ;;  %v4060_v3 = vld [vmem:[%s4457_s9 + $0x3d0] sm:$0xff]  }
  0xfb   : > { %3627 = vmatprep.mubr.bf16.mxu0 %v3984_v4  ;;  %3759 = vmatprep.mubr.bf16.mxu1 %v4014_v5 }
 0x102   : > { %3628 = vmatmul.mubr.bf16.gmra.mrb[60].mxu0 %v3985_v6  ;;  %3760 = vmatmul.mubr.bf16.gmra.mrb[60].mxu1 %v4015_v7 }
 0x103   : > { %3631 = vmatprep.mubr.bf16.mxu0 %v3988_v8  ;;  %3763 = vmatprep.mubr.bf16.mxu1 %v4018_v9 }
 0x10a   : > { %3632 = vmatmul.mubr.bf16.gmra.mrb[64].mxu0 %v3989_v10  ;;  %3764 = vmatmul.mubr.bf16.gmra.mrb[64].mxu1 %v4019_v11 }
 0x10b   : > { %3635 = vmatprep.mubr.bf16.mxu0 %v3992_v12  ;;  %3767 = vmatprep.mubr.bf16.mxu1 %v4022_v13 }
 0x112   : > { %3636 = vmatmul.mubr.bf16.gmra.mrb[68].mxu0 %v3993_v14  ;;  %3768 = vmatmul.mubr.bf16.gmra.mrb[68].mxu1 %v4023_v15 }
 0x113   : > { %3639 = vmatprep.mubr.bf16.mxu0 %v3996_v16  ;;  %3771 = vmatprep.mubr.bf16.mxu1 %v4026_v17  ;;  %v4037_v16 = vld [vmem:[%s4457_s9 + $0x1c8] sm:$0xff]   ;;  %v4061_v17 = vld [vmem:[%s4457_s9 + $0x3d8] sm:$0xff]  }
 0x11a   : > { %3640 = vmatmul.mubr.bf16.gmra.mrb[72].mxu0 %v3997_v18  ;;  %3772 = vmatmul.mubr.bf16.gmra.mrb[72].mxu1 %v4027_v19 }
 0x11b   : > { %3643 = vmatprep.mubr.bf16.mxu0 %v4000_v20  ;;  %3775 = vmatprep.mubr.bf16.mxu1 %v4030_v21 }
 0x122   : > { %3644 = vmatmul.mubr.bf16.gmra.mrb[76].mxu0 %v4001_v22  ;;  %3776 = vmatmul.mubr.bf16.gmra.mrb[76].mxu1 %v4031_v23  ;;  %v4040_v23 = vld [vmem:[%s4457_s9 + $0x1d0] sm:$0xff]  }
 0x123   : > { %3647 = vmatprep.mubr.bf16.mxu0 %v4004_v24  ;;  %3779 = vmatprep.mubr.bf16.mxu1 %v4034_v25  ;;  %v4062_v25 = vld [vmem:[%s4457_s9 + $0x3e0] sm:$0xff]  }
 0x12a   : > { %3648 = vmatmul.mubr.bf16.gmra.mrb[80].mxu0 %v4005_v26  ;;  %3780 = vmatmul.mubr.bf16.gmra.mrb[80].mxu1 %v4035_v27 }
 0x12b   : > { %3651 = vmatprep.mubr.bf16.mxu0 %v4008_v28  ;;  %3783 = vmatprep.mubr.bf16.mxu1 %v4038_v29 }
 0x132   : > { %3652 = vmatmul.mubr.bf16.gmra.mrb[84].mxu0 %v4009_v30  ;;  %3784 = vmatmul.mubr.bf16.gmra.mrb[84].mxu1 %v4039_v31 }
 0x133   : > { %3655 = vmatprep.mubr.bf16.mxu0 %v4012_v32  ;;  %3787 = vmatprep.mubr.bf16.mxu1 %v4042_v33 }
 0x13a   : > { %3656 = vmatmul.mubr.bf16.gmra.mrb[88].mxu0 %v4013_v34  ;;  %3788 = vmatmul.mubr.bf16.gmra.mrb[88].mxu1 %v4043_v35 }
 0x13b   : > { %3659 = vmatprep.mubr.bf16.mxu0 %v4016_v36  ;;  %3791 = vmatprep.mubr.bf16.mxu1 %v4046_v37 }
 0x142   : > { %3660 = vmatmul.mubr.bf16.gmra.mrb[92].mxu0 %v4017_v38  ;;  %3792 = vmatmul.mubr.bf16.gmra.mrb[92].mxu1 %v4047_v39 }
 0x143   : > { %3663 = vmatprep.mubr.bf16.mxu0 %v4020_v40  ;;  %3795 = vmatprep.mubr.bf16.mxu1 %v4050_v41  ;;  %v4041_v40 = vld [vmem:[%s4457_s9 + $0x1d8] sm:$0xff]   ;;  %v4063_v41 = vld [vmem:[%s4457_s9 + $0x3e8] sm:$0xff]  }
 0x14a   : > { %3664 = vmatmul.mubr.bf16.gmra.mrb[96].mxu0 %v4021_v42  ;;  %3796 = vmatmul.mubr.bf16.gmra.mrb[96].mxu1 %v4051_v43 }
 0x14b   : > { %3667 = vmatprep.mubr.bf16.mxu0 %v4024_v44  ;;  %3799 = vmatprep.mubr.bf16.mxu1 %v4054_v45 }
 0x152   : > { %3668 = vmatmul.mubr.bf16.gmra.mrb[100].mxu0 %v4025_v48  ;;  %3800 = vmatmul.mubr.bf16.gmra.mrb[100].mxu1 %v4055_v49  ;;  %v4044_v48 = vld [vmem:[%s4457_s9 + $0x1e0] sm:$0xff]  }
 0x153   : > { %3671 = vmatprep.mubr.bf16.mxu0 %v4028_v50  ;;  %3803 = vmatprep.mubr.bf16.mxu1 %v4056_v51  ;;  %v4064_v50 = vld [vmem:[%s4457_s9 + $0x3f0] sm:$0xff]  }
 0x15a   : > { %3672 = vmatmul.mubr.bf16.gmra.mrb[104].mxu0 %v4029_v52  ;;  %3804 = vmatmul.mubr.bf16.gmra.mrb[104].mxu1 %v4057_v53 }
 0x15b   : > { %3675 = vmatprep.mubr.bf16.mxu0 %v4032_v54  ;;  %3807 = vmatprep.mubr.bf16.mxu1 %v4058_v55 }
 0x15d   : > { %v3569_v57 = vpop.f32.mrb[0].mxu0  ;;  %v4584_v58 = vpop.f32.mrb[0].mxu1 }
 0x15e   : > { %v1403_v59 = vpop.f32.mrb[1].mxu0  ;;  %v4588_v62 = vpop.f32.mrb[1].mxu1  ;;  %v1412_v6 = vadd.f32 %v3569_v57, %v4582_v56 }
 0x15f   : > { %v1404_v63 = vadd.f32 %v4582_v56, %v1403_v59  ;;  %v3570_v0 = vpop.f32.mrb[2].mxu0  ;;  %v4592_v2 = vpop.f32.mrb[2].mxu1 }
 0x160   : > { %v1406_v4 = vpop.f32.mrb[3].mxu0  ;;  %v4595_v5 = vpop.f32.mrb[3].mxu1  ;;  %v1415_v9 = vadd.f32 %v3570_v0, %v4582_v56  ;;  %v2428_v11 = vmax.f32 %v1412_v6, 0.0 }
 0x161   : > { %v1407_v7 = vadd.f32 %v4582_v56, %v1406_v4  ;;  %v2426_v8 = vmax.f32 %v1404_v63, 0.0  ;;  %v4067_v4 = vld [vmem:[#allocation7 + $0x8] sm:$0xff]  }
 0x162   : > { %3676 = vmatmul.mubr.bf16.gmra.mrb[108].mxu0 %v4033_v60  ;;  %3808 = vmatmul.mubr.bf16.gmra.mrb[108].mxu1 %v4059_v61  ;;  %v2429_v19 = vmax.f32 %v1415_v9, 0.0 }
 0x163   : > { %v2427_v10 = vmax.f32 %v1407_v7, 0.0  ;;  %3679 = vmatprep.mubr.bf16.mxu0 %v4036_v1  ;;  %3811 = vmatprep.mubr.bf16.mxu1 %v4060_v3  ;;  %v4045_v7 = vld [vmem:[%s4457_s9 + $0x1e8] sm:$0xff]  }
 0x164   : > { %3826 = vmatpush3.bf16.msra.mxu1 %v4067_v4 }
 0x165   : > { %v2682_v12 = vadd.f32 %v2427_v10, %v2426_v8  ;;  %v3573_v13 = vpop.f32.mrb[4].mxu0  ;;  %v4600_v14 = vpop.f32.mrb[4].mxu1  ;;  %v4065_v8 = vld [vmem:[%s4457_s9 + $0x3f8] sm:$0xff]   ;;  %3827 = vmatprep.subr.bf16.mxu1 %v4239_v47 }
 0x166   : > { %v1419_v15 = vpop.f32.mrb[5].mxu0  ;;  %v4604_v18 = vpop.f32.mrb[5].mxu1  ;;  %v1428_v28 = vadd.f32 %v3573_v13, %v4582_v56 }
 0x167   : > { %v2683_v20 = vadd.f32 %v2682_v12, %v2428_v11  ;;  %v1420_v21 = vadd.f32 %v4582_v56, %v1419_v15  ;;  %v3574_v22 = vpop.f32.mrb[6].mxu0  ;;  %v4608_v24 = vpop.f32.mrb[6].mxu1  ;;  %v4048_v15 = vld [vmem:[%s4457_s9 + $0x1f0] sm:$0xff]  }
 0x168   : > { %v1422_v26 = vpop.f32.mrb[7].mxu0  ;;  %v4611_v27 = vpop.f32.mrb[7].mxu1  ;;  %v1431_v33 = vadd.f32 %v3574_v22, %v4582_v56  ;;  %v2432_v35 = vmax.f32 %v1428_v28, 0.0 }
 0x169   : > { %v2430_v29 = vmax.f32 %v1420_v21, 0.0  ;;  %v2684_v30 = vadd.f32 %v2683_v20, %v2429_v19  ;;  %v1423_v31 = vadd.f32 %v4582_v56, %v1422_v26 }
 0x16a   : > { %3680 = vmatmul.mubr.bf16.gmra.mrb[112].mxu0 %v4037_v16  ;;  %3812 = vmatmul.mubr.bf16.gmra.mrb[112].mxu1 %v4061_v17  ;;  %v2433_v43 = vmax.f32 %v1431_v33, 0.0 }
 0x16b   : > { %v2685_v32 = vadd.f32 %v2684_v30, %v2430_v29  ;;  %v2431_v34 = vmax.f32 %v1423_v31, 0.0  ;;  %3683 = vmatprep.mubr.bf16.mxu0 %v4040_v23  ;;  %3815 = vmatprep.mubr.bf16.mxu1 %v4062_v25 }
 0x16d   : > { %v2686_v36 = vadd.f32 %v2685_v32, %v2431_v34  ;;  %v3577_v37 = vpop.f32.mrb[8].mxu0  ;;  %v4616_v38 = vpop.f32.mrb[8].mxu1  ;;  %v4049_v34 = vld [vmem:[%s4457_s9 + $0x1f8] sm:$0xff]  }
 0x16e   : > { %v1435_v39 = vpop.f32.mrb[9].mxu0  ;;  %v4620_v42 = vpop.f32.mrb[9].mxu1  ;;  %v1444_v53 = vadd.f32 %v3577_v37, %v4582_v56 }
 0x16f   : > { %v2687_v44 = vadd.f32 %v2686_v36, %v2432_v35  ;;  %v1436_v45 = vadd.f32 %v4582_v56, %v1435_v39  ;;  %v3578_v46 = vpop.f32.mrb[10].mxu0  ;;  %v4624_v49 = vpop.f32.mrb[10].mxu1 }
 0x170   : > { %v1438_v51 = vpop.f32.mrb[11].mxu0  ;;  %v4627_v52 = vpop.f32.mrb[11].mxu1  ;;  %v1447_v60 = vadd.f32 %v3578_v46, %v4582_v56  ;;  %v2436_v63 = vmax.f32 %v1444_v53, 0.0 }
 0x171   : > { %v2434_v54 = vmax.f32 %v1436_v45, 0.0  ;;  %v2688_v55 = vadd.f32 %v2687_v44, %v2433_v43  ;;  %v1439_v57 = vadd.f32 %v4582_v56, %v1438_v51 }
 0x172   : > { %3684 = vmatmul.mubr.bf16.gmra.mrb[116].mxu0 %v4041_v40  ;;  %3816 = vmatmul.mubr.bf16.gmra.mrb[116].mxu1 %v4063_v41  ;;  %v2437_v10 = vmax.f32 %v1447_v60, 0.0  ;;  %v4052_v41 = vld [vmem:[%s4457_s9 + $0x200] sm:$0xff]  }
 0x173   : > { %v2689_v59 = vadd.f32 %v2688_v55, %v2434_v54  ;;  %v2435_v61 = vmax.f32 %v1439_v57, 0.0  ;;  %3687 = vmatprep.mubr.bf16.mxu0 %v4044_v48  ;;  %3819 = vmatprep.mubr.bf16.mxu1 %v4064_v50 }
 0x175   : > { %v2690_v0 = vadd.f32 %v2689_v59, %v2435_v61  ;;  %v3581_v1 = vpop.f32.mrb[12].mxu0  ;;  %v4632_v3 = vpop.f32.mrb[12].mxu1 }
 0x176   : > { %v1451_v6 = vpop.f32.mrb[13].mxu0  ;;  %v4636_v9 = vpop.f32.mrb[13].mxu1  ;;  %v1460_v20 = vadd.f32 %v3581_v1, %v4582_v56 }
 0x177   : > { %v2691_v11 = vadd.f32 %v2690_v0, %v2436_v63  ;;  %v1452_v12 = vadd.f32 %v4582_v56, %v1451_v6  ;;  %v3582_v13 = vpop.f32.mrb[14].mxu0  ;;  %v4640_v16 = vpop.f32.mrb[14].mxu1  ;;  %v4053_v0 = vld [vmem:[%s4457_s9 + $0x208] sm:$0xff]   ;;  %s4993_s9 = scalar_lea.hbm %s5042_s5, %s3402_s11 }
 0x178   : > { %v1454_v17 = vpop.f32.mrb[15].mxu0  ;;  %v4642_v19 = vpop.f32.mrb[15].mxu1  ;;  %v1463_v26 = vadd.f32 %v3582_v13, %v4582_v56  ;;  %v2440_v29 = vmax.f32 %v1460_v20, 0.0 }
 0x179   : > { %v2438_v21 = vmax.f32 %v1452_v12, 0.0  ;;  %v2692_v22 = vadd.f32 %v2691_v11, %v2437_v10  ;;  %v1455_v23 = vadd.f32 %v4582_v56, %v1454_v17  ;;  %v4068_v11 = vld [vmem:[#allocation7 + $0x10] sm:$0xff]  }
 0x17a   : > { %3688 = vmatmul.mubr.bf16.gmra.mrb[120].mxu0 %v4045_v7  ;;  %3820 = vmatmul.mubr.bf16.gmra.mrb[120].mxu1 %v4065_v8  ;;  %v2441_v36 = vmax.f32 %v1463_v26, 0.0 }
 0x17b   : > { %v2693_v25 = vadd.f32 %v2692_v22, %v2438_v21  ;;  %v2439_v28 = vmax.f32 %v1455_v23, 0.0  ;;  %3691 = vmatprep.mubr.bf16.mxu0 %v4048_v15  ;;  %3828 = vmatpush3.bf16.msra.mxu1 %v4068_v11 }
 0x17c   : > { %3829 = vmatprep.subr.bf16.mxu1 %v4239_v47  ;;  %3839 = vmatprep.mubr.msk.bf16.mxu1 %vm4240_vm1, %v4239_v47 }
 0x17d   : > { %v2694_v30 = vadd.f32 %v2693_v25, %v2439_v28  ;;  %v3585_v31 = vpop.f32.mrb[16].mxu0  ;;  %v4648_v32 = vpop.f32.mrb[16].mxu1 }
 0x17e   : > { %v1467_v33 = vpop.f32.mrb[17].mxu0  ;;  %v4651_v35 = vpop.f32.mrb[17].mxu1  ;;  %v1476_v46 = vadd.f32 %v3585_v31, %v4582_v56 }
 0x17f   : > { %v2695_v37 = vadd.f32 %v2694_v30, %v2440_v29  ;;  %v1468_v39 = vadd.f32 %v4582_v56, %v1467_v33  ;;  %v3586_v40 = vpop.f32.mrb[18].mxu0  ;;  %v4655_v43 = vpop.f32.mrb[18].mxu1 }
 0x180   : > { %v1470_v44 = vpop.f32.mrb[19].mxu0  ;;  %v4657_v45 = vpop.f32.mrb[19].mxu1  ;;  %v1479_v54 = vadd.f32 %v3586_v40, %v4582_v56  ;;  %v2444_v57 = vmax.f32 %v1476_v46, 0.0 }
 0x181   : > { %v2442_v48 = vmax.f32 %v1468_v39, 0.0  ;;  %v2696_v50 = vadd.f32 %v2695_v37, %v2441_v36  ;;  %v1471_v51 = vadd.f32 %v4582_v56, %v1470_v44 }
 0x182   : > { %3692 = vmatmul.mubr.bf16.gmra.mrb[124].mxu0 %v4049_v34  ;;  %v2445_v4 = vmax.f32 %v1479_v54, 0.0 }
 0x183   : > { %v2697_v53 = vadd.f32 %v2696_v50, %v2442_v48  ;;  %v2443_v55 = vmax.f32 %v1471_v51, 0.0  ;;  %3695 = vmatprep.mubr.bf16.mxu0 %v4052_v41 }
 0x185   : > { %v2698_v59 = vadd.f32 %v2697_v53, %v2443_v55  ;;  %v3589_v60 = vpop.f32.mrb[20].mxu0  ;;  %v4662_v61 = vpop.f32.mrb[20].mxu1 }
 0x186   : > { %v1483_v63 = vpop.f32.mrb[21].mxu0  ;;  %v4665_v1 = vpop.f32.mrb[21].mxu1  ;;  %v1492_v15 = vadd.f32 %v3589_v60, %v4582_v56 }
 0x187   : > { %v2699_v6 = vadd.f32 %v2698_v59, %v2444_v57  ;;  %v1484_v7 = vadd.f32 %v4582_v56, %v1483_v63  ;;  %v3590_v8 = vpop.f32.mrb[22].mxu0  ;;  %v4668_v10 = vpop.f32.mrb[22].mxu1 }
 0x188   : > { %v1486_v12 = vpop.f32.mrb[23].mxu0  ;;  %v4670_v13 = vpop.f32.mrb[23].mxu1  ;;  %v1495_v23 = vadd.f32 %v3590_v8, %v4582_v56  ;;  %v2448_v26 = vmax.f32 %v1492_v15, 0.0 }
 0x189   : > { %v2446_v17 = vmax.f32 %v1484_v7, 0.0  ;;  %v2700_v20 = vadd.f32 %v2699_v6, %v2445_v4  ;;  %v1487_v21 = vadd.f32 %v4582_v56, %v1486_v12 }
 0x18a   : > { %3696 = vmatmul.mubr.bf16.gmra.mrb[128].mxu0 %v4053_v0  ;;  %v2449_v34 = vmax.f32 %v1495_v23, 0.0 }
 0x18b   : > { %v2701_v22 = vadd.f32 %v2700_v20, %v2446_v17  ;;  %v2447_v25 = vmax.f32 %v1487_v21, 0.0 }
 0x18d   : > { %v2702_v28 = vadd.f32 %v2701_v22, %v2447_v25  ;;  %v3593_v29 = vpop.f32.mrb[24].mxu0  ;;  %v4676_v30 = vpop.f32.mrb[24].mxu1 }
 0x18e   : > { %v1499_v31 = vpop.f32.mrb[25].mxu0  ;;  %v4678_v33 = vpop.f32.mrb[25].mxu1  ;;  %v1508_v46 = vadd.f32 %v3593_v29, %v4582_v56 }
 0x18f   : > { %v2703_v36 = vadd.f32 %v2702_v28, %v2448_v26  ;;  %v1500_v37 = vadd.f32 %v4582_v56, %v1499_v31  ;;  %v3594_v39 = vpop.f32.mrb[26].mxu0  ;;  %v4681_v40 = vpop.f32.mrb[26].mxu1 }
 0x190   : > { %v1502_v41 = vpop.f32.mrb[27].mxu0  ;;  %v4683_v44 = vpop.f32.mrb[27].mxu1  ;;  %v1511_v54 = vadd.f32 %v3594_v39, %v4582_v56  ;;  %v2452_v57 = vmax.f32 %v1508_v46, 0.0 }
 0x191   : > { %v2450_v48 = vmax.f32 %v1500_v37, 0.0  ;;  %v2704_v50 = vadd.f32 %v2703_v36, %v2449_v34  ;;  %v1503_v51 = vadd.f32 %v4582_v56, %v1502_v41 }
 0x192   : > { %v2453_v6 = vmax.f32 %v1511_v54, 0.0 }
 0x193   : > { %v2705_v53 = vadd.f32 %v2704_v50, %v2450_v48  ;;  %v2451_v55 = vmax.f32 %v1503_v51, 0.0 }
 0x195   : > { %v2706_v59 = vadd.f32 %v2705_v53, %v2451_v55  ;;  %v3597_v60 = vpop.f32.mrb[28].mxu0  ;;  %v3729_v63 = vpop.f32.mrb[28].mxu1 }
 0x196   : > { %v1515_v0 = vpop.f32.mrb[29].mxu0  ;;  %v2043_v4 = vpop.f32.mrb[29].mxu1  ;;  %v2052_v20 = vadd.f32 %v3729_v63, %v4582_v56  ;;  %v1524_v22 = vadd.f32 %v3597_v60, %v4582_v56 }
 0x197   : > { %v2707_v7 = vadd.f32 %v2706_v59, %v2452_v57  ;;  %v1516_v8 = vadd.f32 %v4582_v56, %v1515_v0  ;;  %v3598_v11 = vpop.f32.mrb[30].mxu0  ;;  %v2044_v12 = vadd.f32 %v4582_v56, %v2043_v4  ;;  %v3730_v15 = vpop.f32.mrb[30].mxu1 }
 0x198   : > { %v1518_v17 = vpop.f32.mrb[31].mxu0  ;;  %v2046_v21 = vpop.f32.mrb[31].mxu1  ;;  %v2055_v29 = vadd.f32 %v3730_v15, %v4582_v56  ;;  %v1527_v36 = vadd.f32 %v3598_v11, %v4582_v56  ;;  %v2588_v39 = vmax.f32 %v2052_v20, 0.0  ;;  %v2456_v46 = vmax.f32 %v1524_v22, 0.0 }
 0x199   : > { %v2454_v23 = vmax.f32 %v1516_v8, 0.0  ;;  %v2708_v25 = vadd.f32 %v2707_v7, %v2453_v6  ;;  %v1519_v26 = vadd.f32 %v4582_v56, %v1518_v17  ;;  %v2586_v28 = vmax.f32 %v2044_v12, 0.0 }
 0x19a   : > { %v2047_v31 = vadd.f32 %v4582_v56, %v2046_v21  ;;  %v2589_v54 = vmax.f32 %v2055_v29, 0.0  ;;  %v2457_v59 = vmax.f32 %v1527_v36, 0.0 }
 0x19b   : > { %v2709_v34 = vadd.f32 %v2708_v25, %v2454_v23  ;;  %v2455_v37 = vmax.f32 %v1519_v26, 0.0 }
 0x19c   : > { %v2587_v41 = vmax.f32 %v2047_v31, 0.0 }
 0x19d   : > { %v2710_v48 = vadd.f32 %v2709_v34, %v2455_v37  ;;  %v3601_v50 = vpop.f32.mrb[32].mxu0  ;;  %v3733_v51 = vpop.f32.mrb[32].mxu1 }
 0x19e   : > { %v1531_v53 = vpop.f32.mrb[33].mxu0  ;;  %v2867_v55 = vadd.f32 %v2587_v41, %v2586_v28  ;;  %v2059_v57 = vpop.f32.mrb[33].mxu1  ;;  %v2068_v11 = vadd.f32 %v3733_v51, %v4582_v56  ;;  %v1540_v17 = vadd.f32 %v3601_v50, %v4582_v56 }
 0x19f   : > { %v2711_v60 = vadd.f32 %v2710_v48, %v2456_v46  ;;  %v1532_v63 = vadd.f32 %v4582_v56, %v1531_v53  ;;  %v3602_v0 = vpop.f32.mrb[34].mxu0  ;;  %v2060_v4 = vadd.f32 %v4582_v56, %v2059_v57  ;;  %v3734_v6 = vpop.f32.mrb[34].mxu1 }
 0x1a0   : > { %v1534_v7 = vpop.f32.mrb[35].mxu0  ;;  %v2868_v8 = vadd.f32 %v2867_v55, %v2588_v39  ;;  %v2062_v12 = vpop.f32.mrb[35].mxu1  ;;  %v2071_v23 = vadd.f32 %v3734_v6, %v4582_v56  ;;  %v1543_v28 = vadd.f32 %v3602_v0, %v4582_v56  ;;  %v2592_v31 = vmax.f32 %v2068_v11, 0.0 }
 0x1a1   : > { %v4699_v15 = vadd.f32 %v2711_v60, %v2457_v59  ;;  %v1535_v20 = vadd.f32 %v4582_v56, %v1534_v7  ;;  %v2590_v21 = vmax.f32 %v2060_v4, 0.0  ;;  %v2063_v25 = vadd.f32 %v4582_v56, %v2062_v12 }
 0x1a2   : > { %v2869_v22 = vadd.f32 %v2868_v8, %v2589_v54  ;;  %v2458_v26 = vmax.f32 %v1532_v63, 0.0  ;;  %v2460_v37 = vmax.f32 %v1540_v17, 0.0  ;;  %v2593_v50 = vmax.f32 %v2071_v23, 0.0 }
 0x1a3   : > { %v2459_v29 = vmax.f32 %v1535_v20, 0.0  ;;  %v2591_v36 = vmax.f32 %v2063_v25, 0.0  ;;  %v2461_v54 = vmax.f32 %v1543_v28, 0.0 }
 0x1a4   : > { %v2870_v34 = vadd.f32 %v2869_v22, %v2590_v21 }
 0x1a5   : > { %v2719_v39 = vadd.f32 %v2459_v29, %v2458_v26  ;;  %v3605_v41 = vpop.f32.mrb[36].mxu0  ;;  %v3737_v46 = vpop.f32.mrb[36].mxu1 }
 0x1a6   : > { %v1547_v48 = vpop.f32.mrb[37].mxu0  ;;  %v2871_v51 = vadd.f32 %v2870_v34, %v2591_v36  ;;  %v2075_v53 = vpop.f32.mrb[37].mxu1  ;;  %v1556_v7 = vadd.f32 %v3605_v41, %v4582_v56  ;;  %v2084_v17 = vadd.f32 %v3737_v46, %v4582_v56 }
 0x1a7   : > { %v2720_v55 = vadd.f32 %v2719_v39, %v2460_v37  ;;  %v1548_v57 = vadd.f32 %v4582_v56, %v1547_v48  ;;  %v3606_v59 = vpop.f32.mrb[38].mxu0  ;;  %v2076_v60 = vadd.f32 %v4582_v56, %v2075_v53  ;;  %v3738_v63 = vpop.f32.mrb[38].mxu1 }
 0x1a8   : > { %v1550_v0 = vpop.f32.mrb[39].mxu0  ;;  %v2872_v4 = vadd.f32 %v2871_v51, %v2592_v31  ;;  %v2078_v6 = vpop.f32.mrb[39].mxu1  ;;  %v1559_v23 = vadd.f32 %v3606_v59, %v4582_v56  ;;  %v2087_v29 = vadd.f32 %v3738_v63, %v4582_v56  ;;  %v2464_v31 = vmax.f32 %v1556_v7, 0.0 }
 0x1a9   : > { %v2462_v8 = vmax.f32 %v1548_v57, 0.0  ;;  %v2721_v11 = vadd.f32 %v2720_v55, %v2461_v54  ;;  %v1551_v12 = vadd.f32 %v4582_v56, %v1550_v0  ;;  %v2594_v20 = vmax.f32 %v2076_v60, 0.0 }
 0x1aa   : > { %v2873_v21 = vadd.f32 %v2872_v4, %v2593_v50  ;;  %v2079_v26 = vadd.f32 %v4582_v56, %v2078_v6  ;;  %v2596_v48 = vmax.f32 %v2084_v17, 0.0  ;;  %v2465_v46 = vmax.f32 %v1559_v23, 0.0 }
 0x1ab   : > { %v2722_v22 = vadd.f32 %v2721_v11, %v2462_v8  ;;  %v2463_v25 = vmax.f32 %v1551_v12, 0.0  ;;  %v2597_v60 = vmax.f32 %v2087_v29, 0.0 }
 0x1ac   : > { %v2874_v28 = vadd.f32 %v2873_v21, %v2594_v20  ;;  %v2595_v37 = vmax.f32 %v2079_v26, 0.0 }
 0x1ad   : > { %v2723_v34 = vadd.f32 %v2722_v22, %v2463_v25  ;;  %v3609_v36 = vpop.f32.mrb[40].mxu0  ;;  %v3741_v39 = vpop.f32.mrb[40].mxu1 }
 0x1ae   : > { %v1563_v41 = vpop.f32.mrb[41].mxu0  ;;  %v2091_v51 = vpop.f32.mrb[41].mxu1  ;;  %v2875_v55 = vadd.f32 %v2874_v28, %v2595_v37  ;;  %v1572_v4 = vadd.f32 %v3609_v36, %v4582_v56  ;;  %v2100_v12 = vadd.f32 %v3741_v39, %v4582_v56  ;;  %v4069_v37 = vld [vmem:[#allocation7 + $0x18] sm:$0xff]  }
 0x1af   : > { %v2724_v53 = vadd.f32 %v2723_v34, %v2464_v31  ;;  %v1564_v50 = vadd.f32 %v4582_v56, %v1563_v41  ;;  %v3610_v54 = vpop.f32.mrb[42].mxu0  ;;  %v3742_v57 = vpop.f32.mrb[42].mxu1  ;;  %v2092_v0 = vadd.f32 %v4582_v56, %v2091_v51  ;;  %3830 = vmatpush3.bf16.msra.mxu1 %v4069_v37 }
 0x1b0   : > { %v1566_v59 = vpop.f32.mrb[43].mxu0  ;;  %v2094_v63 = vpop.f32.mrb[43].mxu1  ;;  %v2876_v11 = vadd.f32 %v2875_v55, %v2596_v48  ;;  %v1575_v21 = vadd.f32 %v3610_v54, %v4582_v56  ;;  %v2103_v26 = vadd.f32 %v3742_v57, %v4582_v56  ;;  %v2468_v28 = vmax.f32 %v1572_v4, 0.0  ;;  %3831 = vmatprep.subr.bf16.mxu1 %v4239_v47 }
 0x1b1   : > { %v2466_v6 = vmax.f32 %v1564_v50, 0.0  ;;  %v2725_v7 = vadd.f32 %v2724_v53, %v2465_v46  ;;  %v1567_v8 = vadd.f32 %v4582_v56, %v1566_v59  ;;  %v2598_v17 = vmax.f32 %v2092_v0, 0.0 }
 0x1b2   : > { %v2095_v23 = vadd.f32 %v4582_v56, %v2094_v63  ;;  %v2877_v25 = vadd.f32 %v2876_v11, %v2597_v60  ;;  %v2600_v48 = vmax.f32 %v2100_v12, 0.0  ;;  %v2469_v46 = vmax.f32 %v1575_v21, 0.0 }
 0x1b3   : > { %v2726_v20 = vadd.f32 %v2725_v7, %v2466_v6  ;;  %v2467_v22 = vmax.f32 %v1567_v8, 0.0  ;;  %v2601_v60 = vmax.f32 %v2103_v26, 0.0 }
 0x1b4   : > { %v2599_v34 = vmax.f32 %v2095_v23, 0.0  ;;  %v2878_v51 = vadd.f32 %v2877_v25, %v2598_v17 }
 0x1b5   : > { %v2727_v29 = vadd.f32 %v2726_v20, %v2467_v22  ;;  %v3613_v31 = vpop.f32.mrb[44].mxu0  ;;  %v3745_v36 = vpop.f32.mrb[44].mxu1 }
 0x1b6   : > { %v1579_v41 = vpop.f32.mrb[45].mxu0  ;;  %v2107_v39 = vpop.f32.mrb[45].mxu1  ;;  %v2879_v0 = vadd.f32 %v2878_v51, %v2599_v34  ;;  %v1588_v4 = vadd.f32 %v3613_v31, %v4582_v56  ;;  %v2116_v12 = vadd.f32 %v3745_v36, %v4582_v56 }
 0x1b7   : > { %v2728_v53 = vadd.f32 %v2727_v29, %v2468_v28  ;;  %v1580_v50 = vadd.f32 %v4582_v56, %v1579_v41  ;;  %v3614_v54 = vpop.f32.mrb[46].mxu0  ;;  %v2108_v55 = vadd.f32 %v4582_v56, %v2107_v39  ;;  %v3746_v59 = vpop.f32.mrb[46].mxu1 }
 0x1b8   : > { %v1582_v57 = vpop.f32.mrb[47].mxu0  ;;  %v2110_v63 = vpop.f32.mrb[47].mxu1  ;;  %v2880_v11 = vadd.f32 %v2879_v0, %v2600_v48  ;;  %v1591_v22 = vadd.f32 %v3614_v54, %v4582_v56  ;;  %v2119_v26 = vadd.f32 %v3746_v59, %v4582_v56  ;;  %v2472_v29 = vmax.f32 %v1588_v4, 0.0 }
 0x1b9   : > { %v2470_v6 = vmax.f32 %v1580_v50, 0.0  ;;  %v2729_v7 = vadd.f32 %v2728_v53, %v2469_v46  ;;  %v1583_v8 = vadd.f32 %v4582_v56, %v1582_v57  ;;  %v2602_v17 = vmax.f32 %v2108_v55, 0.0 }
 0x1ba   : > { %v2111_v20 = vadd.f32 %v4582_v56, %v2110_v63  ;;  %v2881_v25 = vadd.f32 %v2880_v11, %v2601_v60  ;;  %v2604_v51 = vmax.f32 %v2116_v12, 0.0  ;;  %v2473_v36 = vmax.f32 %v1591_v22, 0.0 }
 0x1bb   : > { %v2730_v21 = vadd.f32 %v2729_v7, %v2470_v6  ;;  %v2471_v23 = vmax.f32 %v1583_v8, 0.0  ;;  %v2605_v60 = vmax.f32 %v2119_v26, 0.0 }
 0x1bc   : > { %v2603_v28 = vmax.f32 %v2111_v20, 0.0  ;;  %v2882_v48 = vadd.f32 %v2881_v25, %v2602_v17 }
 0x1bd   : > { %v2731_v31 = vadd.f32 %v2730_v21, %v2471_v23  ;;  %v3617_v34 = vpop.f32.mrb[48].mxu0  ;;  %v3749_v37 = vpop.f32.mrb[48].mxu1  ;;  %v4070_v23 = vld [vmem:[#allocation7 + $0x20] sm:$0xff]  }
 0x1be   : > { %v1595_v41 = vpop.f32.mrb[49].mxu0  ;;  %v2123_v39 = vpop.f32.mrb[49].mxu1  ;;  %v2883_v59 = vadd.f32 %v2882_v48, %v2603_v28  ;;  %v1604_v63 = vadd.f32 %v3617_v34, %v4582_v56  ;;  %v2132_v11 = vadd.f32 %v3749_v37, %v4582_v56  ;;  %3832 = vmatpush3.bf16.msra.mxu1 %v4070_v23 }
 0x1bf   : > { %v2732_v46 = vadd.f32 %v2731_v31, %v2472_v29  ;;  %v1596_v53 = vadd.f32 %v4582_v56, %v1595_v41  ;;  %v3618_v50 = vpop.f32.mrb[50].mxu0  ;;  %v2124_v54 = vadd.f32 %v4582_v56, %v2123_v39  ;;  %v3750_v55 = vpop.f32.mrb[50].mxu1  ;;  %3833 = vmatprep.subr.bf16.mxu1 %v4239_v47 }
 0x1c0   : > { %v1598_v57 = vpop.f32.mrb[51].mxu0  ;;  %v2126_v0 = vpop.f32.mrb[51].mxu1  ;;  %v2884_v8 = vadd.f32 %v2883_v59, %v2604_v51  ;;  %v1607_v21 = vadd.f32 %v3618_v50, %v4582_v56  ;;  %v2135_v26 = vadd.f32 %v3750_v55, %v4582_v56  ;;  %v2476_v29 = vmax.f32 %v1604_v63, 0.0 }
 0x1c1   : > { %v2474_v4 = vmax.f32 %v1596_v53, 0.0  ;;  %v2733_v6 = vadd.f32 %v2732_v46, %v2473_v36  ;;  %v1599_v7 = vadd.f32 %v4582_v56, %v1598_v57  ;;  %v2606_v12 = vmax.f32 %v2124_v54, 0.0 }
 0x1c2   : > { %v2127_v17 = vadd.f32 %v4582_v56, %v2126_v0  ;;  %v2885_v25 = vadd.f32 %v2884_v8, %v2605_v60  ;;  %v2608_v48 = vmax.f32 %v2132_v11, 0.0  ;;  %v2477_v36 = vmax.f32 %v1607_v21, 0.0 }
 0x1c3   : > { %v2734_v20 = vadd.f32 %v2733_v6, %v2474_v4  ;;  %v2475_v22 = vmax.f32 %v1599_v7, 0.0  ;;  %v2609_v60 = vmax.f32 %v2135_v26, 0.0 }
 0x1c4   : > { %v2607_v28 = vmax.f32 %v2127_v17, 0.0  ;;  %v2886_v37 = vadd.f32 %v2885_v25, %v2606_v12 }
 0x1c5   : > { %v2735_v31 = vadd.f32 %v2734_v20, %v2475_v22  ;;  %v3621_v34 = vpop.f32.mrb[52].mxu0  ;;  %v3753_v41 = vpop.f32.mrb[52].mxu1 }
 0x1c6   : > { %v1611_v51 = vpop.f32.mrb[53].mxu0  ;;  %v2139_v39 = vpop.f32.mrb[53].mxu1  ;;  %v2887_v59 = vadd.f32 %v2886_v37, %v2607_v28  ;;  %v1620_v63 = vadd.f32 %v3621_v34, %v4582_v56  ;;  %v2148_v11 = vadd.f32 %v3753_v41, %v4582_v56 }
 0x1c7   : > { %v2736_v46 = vadd.f32 %v2735_v31, %v2476_v29  ;;  %v1612_v53 = vadd.f32 %v4582_v56, %v1611_v51  ;;  %v3622_v50 = vpop.f32.mrb[54].mxu0  ;;  %v2140_v54 = vadd.f32 %v4582_v56, %v2139_v39  ;;  %v3754_v55 = vpop.f32.mrb[54].mxu1 }
 0x1c8   : > { %v1614_v57 = vpop.f32.mrb[55].mxu0  ;;  %v2142_v0 = vpop.f32.mrb[55].mxu1  ;;  %v2888_v8 = vadd.f32 %v2887_v59, %v2608_v48  ;;  %v1623_v21 = vadd.f32 %v3622_v50, %v4582_v56  ;;  %v2151_v25 = vadd.f32 %v3754_v55, %v4582_v56  ;;  %v2480_v28 = vmax.f32 %v1620_v63, 0.0 }
 0x1c9   : > { %v2478_v4 = vmax.f32 %v1612_v53, 0.0  ;;  %v2737_v6 = vadd.f32 %v2736_v46, %v2477_v36  ;;  %v1615_v7 = vadd.f32 %v4582_v56, %v1614_v57  ;;  %v2610_v12 = vmax.f32 %v2140_v54, 0.0 }
 0x1ca   : > { %v2143_v17 = vadd.f32 %v4582_v56, %v2142_v0  ;;  %v2889_v23 = vadd.f32 %v2888_v8, %v2609_v60  ;;  %v2612_v37 = vmax.f32 %v2148_v11, 0.0  ;;  %v2481_v41 = vmax.f32 %v1623_v21, 0.0 }
 0x1cb   : > { %v2738_v20 = vadd.f32 %v2737_v6, %v2478_v4  ;;  %v2479_v22 = vmax.f32 %v1615_v7, 0.0  ;;  %v2713_v57 = vrot.slane %v4699_v15, 4  ;;  %v2613_v60 = vmax.f32 %v2151_v25, 0.0 }
 0x1cc   : > { %v2611_v26 = vmax.f32 %v2143_v17, 0.0  ;;  %v2890_v48 = vadd.f32 %v2889_v23, %v2610_v12 }
 0x1cd   : > { %v2739_v29 = vadd.f32 %v2738_v20, %v2479_v22  ;;  %v3625_v31 = vpop.f32.mrb[56].mxu0  ;;  %v3757_v34 = vpop.f32.mrb[56].mxu1  ;;  %v2714_v23 = vadd.f32 %v2713_v57, %v4699_v15 }
 0x1ce   : > { %v1627_v51 = vpop.f32.mrb[57].mxu0  ;;  %v2155_v39 = vpop.f32.mrb[57].mxu1  ;;  %v2891_v59 = vadd.f32 %v2890_v48, %v2611_v26  ;;  %v1636_v63 = vadd.f32 %v3625_v31, %v4582_v56  ;;  %v2164_v11 = vadd.f32 %v3757_v34, %v4582_v56 }
 0x1cf   : > { %v2740_v36 = vadd.f32 %v2739_v29, %v2480_v28  ;;  %v1628_v46 = vadd.f32 %v4582_v56, %v1627_v51  ;;  %v3626_v53 = vpop.f32.mrb[58].mxu0  ;;  %v2156_v50 = vadd.f32 %v4582_v56, %v2155_v39  ;;  %v3758_v54 = vpop.f32.mrb[58].mxu1  ;;  %v2715_v57 = vrot.slane %v2714_v23, 2 }
 0x1d0   : > { %v1630_v55 = vpop.f32.mrb[59].mxu0  ;;  %v2158_v0 = vpop.f32.mrb[59].mxu1  ;;  %v2892_v8 = vadd.f32 %v2891_v59, %v2612_v37  ;;  %v1639_v21 = vadd.f32 %v3626_v53, %v4582_v56  ;;  %v2167_v26 = vadd.f32 %v3758_v54, %v4582_v56  ;;  %v2484_v29 = vmax.f32 %v1636_v63, 0.0 }
 0x1d1   : > { %v2482_v4 = vmax.f32 %v1628_v46, 0.0  ;;  %v2741_v6 = vadd.f32 %v2740_v36, %v2481_v41  ;;  %v1631_v7 = vadd.f32 %v4582_v56, %v1630_v55  ;;  %v2614_v12 = vmax.f32 %v2156_v50, 0.0 }
 0x1d2   : > { %v2159_v17 = vadd.f32 %v4582_v56, %v2158_v0  ;;  %v2893_v25 = vadd.f32 %v2892_v8, %v2613_v60  ;;  %v2616_v39 = vmax.f32 %v2164_v11, 0.0  ;;  %v2485_v36 = vmax.f32 %v1639_v21, 0.0 }
 0x1d3   : > { %v2742_v20 = vadd.f32 %v2741_v6, %v2482_v4  ;;  %v2483_v22 = vmax.f32 %v1631_v7, 0.0  ;;  %v2617_v54 = vmax.f32 %v2167_v26, 0.0 }
 0x1d4   : > { %v2615_v28 = vmax.f32 %v2159_v17, 0.0  ;;  %v2894_v34 = vadd.f32 %v2893_v25, %v2614_v12 }
 0x1d5   : > { %v2743_v31 = vadd.f32 %v2742_v20, %v2483_v22  ;;  %v3629_v51 = vpop.f32.mrb[60].mxu0  ;;  %v3761_v48 = vpop.f32.mrb[60].mxu1 }
 0x1d6   : > { %v1643_v37 = vpop.f32.mrb[61].mxu0  ;;  %v2171_v41 = vpop.f32.mrb[61].mxu1  ;;  %v2895_v59 = vadd.f32 %v2894_v34, %v2615_v28  ;;  %v2180_v0 = vadd.f32 %v3761_v48, %v4582_v56  ;;  %v1652_v4 = vadd.f32 %v3629_v51, %v4582_v56 }
 0x1d7   : > { %v2744_v46 = vadd.f32 %v2743_v31, %v2484_v29  ;;  %v1644_v50 = vadd.f32 %v4582_v56, %v1643_v37  ;;  %v3630_v53 = vpop.f32.mrb[62].mxu0  ;;  %v2172_v55 = vadd.f32 %v4582_v56, %v2171_v41  ;;  %v3762_v15 = vpop.f32.mrb[62].mxu1  ;;  %v2716_v31 = vadd.f32 %v2715_v57, %v2714_v23 }
 0x1d8   : > { %v1646_v60 = vpop.f32.mrb[63].mxu0  ;;  %v2174_v63 = vpop.f32.mrb[63].mxu1  ;;  %v2896_v11 = vadd.f32 %v2895_v59, %v2616_v39  ;;  %v2183_v17 = vadd.f32 %v3762_v15, %v4582_v56  ;;  %v1655_v22 = vadd.f32 %v3630_v53, %v4582_v56  ;;  %v2620_v28 = vmax.f32 %v2180_v0, 0.0 }
 0x1d9   : > { %v2486_v6 = vmax.f32 %v1644_v50, 0.0  ;;  %v2745_v7 = vadd.f32 %v2744_v46, %v2485_v36  ;;  %v1647_v8 = vadd.f32 %v4582_v56, %v1646_v60  ;;  %v2618_v12 = vmax.f32 %v2172_v55, 0.0 }
 0x1da   : > { %v2175_v20 = vadd.f32 %v4582_v56, %v2174_v63  ;;  %v4766_v26 = vadd.f32 %v2896_v11, %v2617_v54  ;;  %v2488_v51 = vmax.f32 %v1652_v4, 0.0  ;;  %v2621_v39 = vmax.f32 %v2183_v17, 0.0 }
 0x1db   : > { %v2746_v21 = vadd.f32 %v2745_v7, %v2486_v6  ;;  %v2487_v25 = vmax.f32 %v1647_v8, 0.0  ;;  %v2489_v50 = vmax.f32 %v1655_v22, 0.0  ;;  %v2717_v23 = vrot.slane %v2716_v31, 1 }
 0x1dc   : > { %v2619_v29 = vmax.f32 %v2175_v20, 0.0 }
 0x1dd   : > { %v2747_v48 = vadd.f32 %v2746_v21, %v2487_v25  ;;  %v3633_v37 = vpop.f32.mrb[64].mxu0  ;;  %v3765_v34 = vpop.f32.mrb[64].mxu1 }
 0x1de   : > { %v1659_v41 = vpop.f32.mrb[65].mxu0  ;;  %v2904_v36 = vadd.f32 %v2619_v29, %v2618_v12  ;;  %v2187_v46 = vpop.f32.mrb[65].mxu1  ;;  %v1668_v4 = vadd.f32 %v3633_v37, %v4582_v56  ;;  %v2196_v8 = vadd.f32 %v3765_v34, %v4582_v56 }
 0x1df   : > { %v2748_v55 = vadd.f32 %v2747_v48, %v2488_v51  ;;  %v1660_v15 = vadd.f32 %v4582_v56, %v1659_v41  ;;  %v3634_v60 = vpop.f32.mrb[66].mxu0  ;;  %v2188_v53 = vadd.f32 %v4582_v56, %v2187_v46  ;;  %v3766_v54 = vpop.f32.mrb[66].mxu1  ;;  %v2718_v46 = vadd.f32 %v2717_v23, %v2716_v31 }
 0x1e0   : > { %v1662_v59 = vpop.f32.mrb[67].mxu0  ;;  %v2905_v0 = vadd.f32 %v2904_v36, %v2620_v28  ;;  %v2190_v63 = vpop.f32.mrb[67].mxu1  ;;  %v1671_v7 = vadd.f32 %v3634_v60, %v4582_v56  ;;  %v2199_v28 = vadd.f32 %v3766_v54, %v4582_v56  ;;  %v2492_v51 = vmax.f32 %v1668_v4, 0.0 }
 0x1e1   : > { %v2749_v57 = vadd.f32 %v2748_v55, %v2489_v50  ;;  %v1663_v6 = vadd.f32 %v4582_v56, %v1662_v59  ;;  %v2622_v11 = vmax.f32 %v2188_v53, 0.0  ;;  %v2490_v20 = vmax.f32 %v1660_v15, 0.0  ;;  %v4779_v15 = vld [vmem:[%s5039_s2] ss:$0 sm:$0xff] }
 0x1e2   : > { %v2906_v12 = vadd.f32 %v2905_v0, %v2621_v39  ;;  %v2191_v22 = vadd.f32 %v4582_v56, %v2190_v63  ;;  %v2493_v50 = vmax.f32 %v1671_v7, 0.0  ;;  %v2624_v34 = vmax.f32 %v2196_v8, 0.0 }
 0x1e3   : > { %v2750_v17 = vrot.slane %v2749_v57, 4  ;;  %v2491_v21 = vmax.f32 %v1663_v6, 0.0  ;;  %v2625_v31 = vmax.f32 %v2199_v28, 0.0 }
 0x1e4   : > { %v2907_v25 = vadd.f32 %v2906_v12, %v2622_v11  ;;  %v2623_v41 = vmax.f32 %v2191_v22, 0.0  ;;  %v2979_v11 = vmul.f32 0.00390625, %v2718_v46 }
 0x1e5   : > { %v2751_v29 = vadd.f32 %v2750_v17, %v2749_v57  ;;  %v2756_v48 = vadd.f32 %v2491_v21, %v2490_v20  ;;  %v3637_v37 = vpop.f32.mrb[68].mxu0  ;;  %v3769_v36 = vpop.f32.mrb[68].mxu1 }
 0x1e6   : > { %v1675_v55 = vpop.f32.mrb[69].mxu0  ;;  %v2203_v60 = vpop.f32.mrb[69].mxu1  ;;  %v2908_v59 = vadd.f32 %v2907_v25, %v2623_v41  ;;  %v1684_v63 = vadd.f32 %v4779_v15, %v3637_v37  ;;  %v2212_v17 = vadd.f32 %v4779_v15, %v3769_v36  ;;  %v2987_v36 = vpack.c.bf16 %v2979_v11, %v2979_v11 }
 0x1e7   : > { %v2752_v39 = vrot.slane %v2751_v29, 2  ;;  %v2757_v53 = vadd.f32 %v2756_v48, %v2492_v51  ;;  %v1676_v56 = vadd.f32 %v4779_v15, %v1675_v55  ;;  %v3638_v54 = vpop.f32.mrb[70].mxu0  ;;  %v3770_v0 = vpop.f32.mrb[70].mxu1  ;;  %v2204_v20 = vadd.f32 %v4779_v15, %v2203_v60 }
 0x1e8   : > { %v1678_v57 = vpop.f32.mrb[71].mxu0  ;;  %v2206_v23 = vpop.f32.mrb[71].mxu1  ;;  %v2909_v12 = vadd.f32 %v2908_v59, %v2624_v34  ;;  %v1687_v25 = vadd.f32 %v4779_v15, %v3638_v54  ;;  %v2215_v28 = vadd.f32 %v4779_v15, %v3770_v0  ;;  %v2628_v60 = vmax.f32 %v2212_v17, 0.0 }
 0x1e9   : > { %v2753_v4 = vadd.f32 %v2752_v39, %v2751_v29  ;;  %v2494_v6 = vmax.f32 %v1676_v56, 0.0  ;;  %v2758_v7 = vadd.f32 %v2757_v53, %v2493_v50  ;;  %v1679_v8 = vadd.f32 %v4779_v15, %v1678_v57 }
 0x1ea   : > { %v2626_v48 = vmax.f32 %v2204_v20, 0.0  ;;  %v2910_v37 = vadd.f32 %v2909_v12, %v2625_v31  ;;  %v2207_v29 = vadd.f32 %v4779_v15, %v2206_v23  ;;  %v2496_v50 = vmax.f32 %v1684_v63, 0.0 }
 0x1eb   : > { %v2754_v21 = vrot.slane %v2753_v4, 1  ;;  %v2759_v22 = vadd.f32 %v2758_v7, %v2494_v6  ;;  %v2495_v51 = vmax.f32 %v1679_v8, 0.0  ;;  %v2497_v57 = vmax.f32 %v1687_v25, 0.0 }
 0x1ec   : > { %v2911_v53 = vadd.f32 %v2910_v37, %v2626_v48  ;;  %v2627_v56 = vmax.f32 %v2207_v29, 0.0  ;;  %v2629_v63 = vmax.f32 %v2215_v28, 0.0 }
 0x1ed   : > { %v2755_v41 = vadd.f32 %v2754_v21, %v2753_v4  ;;  %v2760_v46 = vadd.f32 %v2759_v22, %v2495_v51  ;;  %v3641_v55 = vpop.f32.mrb[72].mxu0  ;;  %v3773_v34 = vpop.f32.mrb[72].mxu1  ;;  %v3026_v51 = vunpack.c.l.b16 %v2987_v36 }
 0x1ee   : > { %v1691_v39 = vpop.f32.mrb[73].mxu0  ;;  %v2219_v59 = vpop.f32.mrb[73].mxu1  ;;  %v1700_v23 = vadd.f32 %v4779_v15, %v3641_v55  ;;  %v2912_v8 = vadd.f32 %v2911_v53, %v2627_v56  ;;  %v2228_v48 = vadd.f32 %v4779_v15, %v3773_v34 }
 0x1ef   : > { %v2980_v54 = vmul.f32 0.00390625, %v2755_v41  ;;  %v2761_v6 = vadd.f32 %v2760_v46, %v2496_v50  ;;  %v1692_v31 = vadd.f32 %v4779_v15, %v1691_v39  ;;  %v3642_v0 = vpop.f32.mrb[74].mxu0  ;;  %v3774_v7 = vpop.f32.mrb[74].mxu1  ;;  %v2220_v12 = vadd.f32 %v4779_v15, %v2219_v59 }
 0x1f0   : > { %v1694_v4 = vpop.f32.mrb[75].mxu0  ;;  %v2222_v11 = vpop.f32.mrb[75].mxu1  ;;  %v2913_v25 = vadd.f32 %v2912_v8, %v2628_v60  ;;  %v1703_v50 = vadd.f32 %v4779_v15, %v3642_v0  ;;  %v2231_v55 = vadd.f32 %v4779_v15, %v3774_v7  ;;  %v2500_v56 = vmax.f32 %v1700_v23, 0.0 }
 0x1f1   : > { %v2988_v20 = vpack.c.bf16 %v2980_v54, %v2980_v54  ;;  %v2498_v17 = vmax.f32 %v1692_v31, 0.0  ;;  %v2762_v21 = vadd.f32 %v2761_v6, %v2497_v57  ;;  %v1695_v22 = vadd.f32 %v4779_v15, %v1694_v4  ;;  %v4071_v54 = vld [vmem:[#allocation7 + $0x28] sm:$0xff]  }
 0x1f2   : > { %v2630_v37 = vmax.f32 %v2220_v12, 0.0  ;;  %v2914_v28 = vadd.f32 %v2913_v25, %v2629_v63  ;;  %v2223_v39 = vadd.f32 %v4779_v15, %v2222_v11  ;;  %v2632_v57 = vmax.f32 %v2228_v48, 0.0  ;;  %3834 = vmatpush3.bf16.msra.mxu1 %v4071_v54 }
 0x1f3   : > { %v3027_v29 = vunpack.c.l.b16 %v2988_v20  ;;  %v2763_v41 = vadd.f32 %v2762_v21, %v2498_v17  ;;  %v2499_v46 = vmax.f32 %v1695_v22, 0.0  ;;  %v2501_v0 = vmax.f32 %v1703_v50, 0.0  ;;  %3835 = vmatprep.subr.bf16.mxu1 %v4239_v47 }
 0x1f4   : > { %v2915_v6 = vadd.f32 %v2914_v28, %v2630_v37  ;;  %v2631_v31 = vmax.f32 %v2223_v39, 0.0  ;;  %v2633_v23 = vmax.f32 %v2231_v55, 0.0 }
 0x1f5   : > { %v4798_v53 = vsel %vm3034_vm0, %v3027_v29, %v3026_v51  ;;  %v2764_v59 = vadd.f32 %v2763_v41, %v2499_v46  ;;  %v3645_v36 = vpop.f32.mrb[76].mxu0  ;;  %v3777_v60 = vpop.f32.mrb[76].mxu1 }
 0x1f6   : > { %v1707_v34 = vpop.f32.mrb[77].mxu0  ;;  %v2235_v4 = vpop.f32.mrb[77].mxu1  ;;  %v2916_v17 = vadd.f32 %v2915_v6, %v2631_v31  ;;  %v1716_v22 = vadd.f32 %v4779_v15, %v3645_v36  ;;  %v2244_v29 = vadd.f32 %v4779_v15, %v3777_v60 }
 0x1f7   : > { %v2765_v8 = vadd.f32 %v2764_v59, %v2500_v56  ;;  %v1708_v63 = vadd.f32 %v4779_v15, %v1707_v34  ;;  %v3646_v7 = vpop.f32.mrb[78].mxu0  ;;  %v2236_v12 = vadd.f32 %v4779_v15, %v2235_v4  ;;  %v3778_v11 = vpop.f32.mrb[78].mxu1 }
 0x1f8   : > { %v1710_v20 = vpop.f32.mrb[79].mxu0  ;;  %v2238_v21 = vpop.f32.mrb[79].mxu1  ;;  %v2917_v37 = vadd.f32 %v2916_v17, %v2632_v57  ;;  %v1719_v28 = vadd.f32 %v4779_v15, %v3646_v7  ;;  %v2247_v56 = vadd.f32 %v4779_v15, %v3778_v11  ;;  %v2504_v54 = vmax.f32 %v1716_v22, 0.0 }
 0x1f9   : > { %v2502_v51 = vmax.f32 %v1708_v63, 0.0  ;;  %v2766_v25 = vadd.f32 %v2765_v8, %v2501_v0  ;;  %v1711_v48 = vadd.f32 %v4779_v15, %v1710_v20  ;;  %v2634_v41 = vmax.f32 %v2236_v12, 0.0 }
 0x1fa   : > { %v2239_v50 = vadd.f32 %v4779_v15, %v2238_v21  ;;  %v2918_v39 = vadd.f32 %v2917_v37, %v2633_v23  ;;  %v2636_v4 = vmax.f32 %v2244_v29, 0.0  ;;  %v2505_v60 = vmax.f32 %v1719_v28, 0.0 }
 0x1fb   : > { %v2767_v46 = vadd.f32 %v2766_v25, %v2502_v51  ;;  %v2503_v55 = vmax.f32 %v1711_v48, 0.0  ;;  %v2637_v17 = vmax.f32 %v2247_v56, 0.0 }
 0x1fc   : > { %v2635_v59 = vmax.f32 %v2239_v50, 0.0  ;;  %v2919_v57 = vadd.f32 %v2918_v39, %v2634_v41 }
 0x1fd   : > { %v2768_v36 = vadd.f32 %v2767_v46, %v2503_v55  ;;  %v3649_v34 = vpop.f32.mrb[80].mxu0  ;;  %v3781_v6 = vpop.f32.mrb[80].mxu1 }
 0x1fe   : > { %v1723_v31 = vpop.f32.mrb[81].mxu0  ;;  %v2251_v0 = vpop.f32.mrb[81].mxu1  ;;  %v2920_v11 = vadd.f32 %v2919_v57, %v2635_v59  ;;  %v1732_v22 = vadd.f32 %v4779_v15, %v3649_v34  ;;  %v2260_v29 = vadd.f32 %v4779_v15, %v3781_v6 }
 0x1ff   : > { %v2769_v8 = vadd.f32 %v2768_v36, %v2504_v54  ;;  %v1724_v63 = vadd.f32 %v4779_v15, %v1723_v31  ;;  %v3650_v12 = vpop.f32.mrb[82].mxu0  ;;  %v2252_v7 = vadd.f32 %v4779_v15, %v2251_v0  ;;  %v3782_v20 = vpop.f32.mrb[82].mxu1 }
 0x200   : > { %v1726_v23 = vpop.f32.mrb[83].mxu0  ;;  %v2254_v21 = vpop.f32.mrb[83].mxu1  ;;  %v2921_v37 = vadd.f32 %v2920_v11, %v2636_v4  ;;  %v1735_v28 = vadd.f32 %v4779_v15, %v3650_v12  ;;  %v2263_v56 = vadd.f32 %v4779_v15, %v3782_v20  ;;  %v2508_v54 = vmax.f32 %v1732_v22, 0.0 }
 0x201   : > { %v2506_v51 = vmax.f32 %v1724_v63, 0.0  ;;  %v2770_v25 = vadd.f32 %v2769_v8, %v2505_v60  ;;  %v1727_v48 = vadd.f32 %v4779_v15, %v1726_v23  ;;  %v2638_v41 = vmax.f32 %v2252_v7, 0.0 }
 0x202   : > { %v2255_v50 = vadd.f32 %v4779_v15, %v2254_v21  ;;  %v2922_v39 = vadd.f32 %v2921_v37, %v2637_v17  ;;  %v2640_v0 = vmax.f32 %v2260_v29, 0.0  ;;  %v2509_v6 = vmax.f32 %v1735_v28, 0.0 }
 0x203   : > { %v2771_v46 = vadd.f32 %v2770_v25, %v2506_v51  ;;  %v2507_v55 = vmax.f32 %v1727_v48, 0.0  ;;  %v2641_v11 = vmax.f32 %v2263_v56, 0.0 }
 0x204   : > { %v2639_v59 = vmax.f32 %v2255_v50, 0.0  ;;  %v2923_v4 = vadd.f32 %v2922_v39, %v2638_v41 }
 0x205   : > { %v2772_v36 = vadd.f32 %v2771_v46, %v2507_v55  ;;  %v3653_v34 = vpop.f32.mrb[84].mxu0  ;;  %v3785_v31 = vpop.f32.mrb[84].mxu1 }
 0x206   : > { %v1739_v57 = vpop.f32.mrb[85].mxu0  ;;  %v2267_v60 = vpop.f32.mrb[85].mxu1  ;;  %v1748_v17 = vadd.f32 %v4779_v15, %v3653_v34  ;;  %v2924_v21 = vadd.f32 %v2923_v4, %v2639_v59  ;;  %v2276_v37 = vadd.f32 %v4779_v15, %v3785_v31 }
 0x207   : > { %v2773_v8 = vadd.f32 %v2772_v36, %v2508_v54  ;;  %v1740_v63 = vadd.f32 %v4779_v15, %v1739_v57  ;;  %v3654_v7 = vpop.f32.mrb[86].mxu0  ;;  %v2268_v12 = vadd.f32 %v4779_v15, %v2267_v60  ;;  %v3786_v23 = vpop.f32.mrb[86].mxu1 }
 0x208   : > { %v1742_v20 = vpop.f32.mrb[87].mxu0  ;;  %v2270_v22 = vpop.f32.mrb[87].mxu1  ;;  %v1751_v29 = vadd.f32 %v4779_v15, %v3654_v7  ;;  %v2925_v41 = vadd.f32 %v2924_v21, %v2640_v0  ;;  %v2279_v54 = vadd.f32 %v4779_v15, %v3786_v23  ;;  %v2512_v59 = vmax.f32 %v1748_v17, 0.0 }
 0x209   : > { %v2510_v51 = vmax.f32 %v1740_v63, 0.0  ;;  %v2774_v25 = vadd.f32 %v2773_v8, %v2509_v6  ;;  %v1743_v48 = vadd.f32 %v4779_v15, %v1742_v20  ;;  %v2642_v50 = vmax.f32 %v2268_v12, 0.0 }
 0x20a   : > { %v2271_v46 = vadd.f32 %v4779_v15, %v2270_v22  ;;  %v2926_v39 = vadd.f32 %v2925_v41, %v2641_v11  ;;  %v2513_v4 = vmax.f32 %v1751_v29, 0.0  ;;  %v2644_v6 = vmax.f32 %v2276_v37, 0.0  ;;  %v4072_v11 = vld [vmem:[#allocation7 + $0x30] sm:$0xff]   ;;  %v4073_v29 = vld [vmem:[#allocation7 + $0x38] sm:$0xff]  }
 0x20b   : > { %v2775_v28 = vadd.f32 %v2774_v25, %v2510_v51  ;;  %v2511_v55 = vmax.f32 %v1743_v48, 0.0  ;;  %v2645_v23 = vmax.f32 %v2279_v54, 0.0  ;;  %3836 = vmatpush3.bf16.msra.mxu1 %v4072_v11 }
 0x20c   : > { %v2643_v56 = vmax.f32 %v2271_v46, 0.0  ;;  %v2927_v31 = vadd.f32 %v2926_v39, %v2642_v50  ;;  %3837 = vmatprep.subr.bf16.mxu1 %v4239_v47 }
 0x20d   : > { %v2776_v36 = vadd.f32 %v2775_v28, %v2511_v55  ;;  %v3657_v34 = vpop.f32.mrb[88].mxu0  ;;  %v3789_v57 = vpop.f32.mrb[88].mxu1 }
 0x20e   : > { %v1755_v60 = vpop.f32.mrb[89].mxu0  ;;  %v2283_v8 = vpop.f32.mrb[89].mxu1  ;;  %v2928_v22 = vadd.f32 %v2927_v31, %v2643_v56  ;;  %v1764_v51 = vadd.f32 %v4779_v15, %v3657_v34  ;;  %v2292_v50 = vadd.f32 %v4779_v15, %v3789_v57 }
 0x20f   : > { %v2777_v63 = vadd.f32 %v2776_v36, %v2512_v59  ;;  %v1756_v0 = vadd.f32 %v4779_v15, %v1755_v60  ;;  %v3658_v7 = vpop.f32.mrb[90].mxu0  ;;  %v2284_v12 = vadd.f32 %v4779_v15, %v2283_v8  ;;  %v3790_v20 = vpop.f32.mrb[90].mxu1  ;;  %3838 = vmatpush3.bf16.msra.mxu1 %v4073_v29 }
 0x210   : > { %v1758_v21 = vpop.f32.mrb[91].mxu0  ;;  %v2286_v17 = vpop.f32.mrb[91].mxu1  ;;  %v2929_v41 = vadd.f32 %v2928_v22, %v2644_v6  ;;  %v1767_v39 = vadd.f32 %v4779_v15, %v3658_v7  ;;  %v2295_v59 = vadd.f32 %v4779_v15, %v3790_v20  ;;  %v2516_v34 = vmax.f32 %v1764_v51, 0.0 }
 0x211   : > { %v2514_v25 = vmax.f32 %v1756_v0, 0.0  ;;  %v2778_v48 = vadd.f32 %v2777_v63, %v2513_v4  ;;  %v1759_v37 = vadd.f32 %v4779_v15, %v1758_v21  ;;  %v2646_v46 = vmax.f32 %v2284_v12, 0.0 }
 0x212   : > { %v2287_v28 = vadd.f32 %v4779_v15, %v2286_v17  ;;  %v2930_v56 = vadd.f32 %v2929_v41, %v2645_v23  ;;  %v2648_v57 = vmax.f32 %v2292_v50, 0.0  ;;  %v2517_v0 = vmax.f32 %v1767_v39, 0.0 }
 0x213   : > { %v2779_v55 = vadd.f32 %v2778_v48, %v2514_v25  ;;  %v2515_v54 = vmax.f32 %v1759_v37, 0.0  ;;  %v2649_v20 = vmax.f32 %v2295_v59, 0.0 }
 0x214   : > { %v2647_v36 = vmax.f32 %v2287_v28, 0.0  ;;  %v2931_v8 = vadd.f32 %v2930_v56, %v2646_v46 }
 0x215   : > { %v2780_v4 = vadd.f32 %v2779_v55, %v2515_v54  ;;  %v3661_v60 = vpop.f32.mrb[92].mxu0  ;;  %v3793_v31 = vpop.f32.mrb[92].mxu1 }
 0x216   : > { %v1771_v6 = vpop.f32.mrb[93].mxu0  ;;  %v2299_v63 = vpop.f32.mrb[93].mxu1  ;;  %v2932_v22 = vadd.f32 %v2931_v8, %v2647_v36  ;;  %v2308_v17 = vadd.f32 %v4779_v15, %v3793_v31  ;;  %v1780_v25 = vadd.f32 %v4779_v15, %v3661_v60 }
 0x217   : > { %v2781_v12 = vadd.f32 %v2780_v4, %v2516_v34  ;;  %v1772_v47 = vadd.f32 %v4779_v15, %v1771_v6  ;;  %v3662_v11 = vpop.f32.mrb[94].mxu0  ;;  %v2300_v7 = vadd.f32 %v4779_v15, %v2299_v63  ;;  %v3794_v21 = vpop.f32.mrb[94].mxu1 }
 0x218   : > { %v1774_v23 = vpop.f32.mrb[95].mxu0  ;;  %v2302_v51 = vpop.f32.mrb[95].mxu1  ;;  %v2933_v41 = vadd.f32 %v2932_v22, %v2648_v57  ;;  %v2311_v46 = vadd.f32 %v4779_v15, %v3794_v21  ;;  %v1783_v39 = vadd.f32 %v4779_v15, %v3662_v11  ;;  %v2652_v59 = vmax.f32 %v2308_v17, 0.0 }
 0x219   : > { %v2518_v48 = vmax.f32 %v1772_v47, 0.0  ;;  %v2782_v37 = vadd.f32 %v2781_v12, %v2517_v0  ;;  %v1775_v29 = vadd.f32 %v4779_v15, %v1774_v23  ;;  %v2650_v50 = vmax.f32 %v2300_v7, 0.0 }
 0x21a   : > { %v2303_v28 = vadd.f32 %v4779_v15, %v2302_v51  ;;  %v4843_v56 = vadd.f32 %v2933_v41, %v2649_v20  ;;  %v2520_v34 = vmax.f32 %v1780_v25, 0.0  ;;  %v2653_v8 = vmax.f32 %v2311_v46, 0.0 }
 0x21b   : > { %v2783_v55 = vadd.f32 %v2782_v37, %v2518_v48  ;;  %v2519_v54 = vmax.f32 %v1775_v29, 0.0  ;;  %v2521_v0 = vmax.f32 %v1783_v39, 0.0 }
 0x21c   : > { %v2651_v36 = vmax.f32 %v2303_v28, 0.0 }
 0x21d   : > { %v2784_v4 = vadd.f32 %v2783_v55, %v2519_v54  ;;  %v3665_v60 = vpop.f32.mrb[96].mxu0  ;;  %v3797_v31 = vpop.f32.mrb[96].mxu1 }
 0x21e   : > { %v1787_v6 = vpop.f32.mrb[97].mxu0  ;;  %v2941_v57 = vadd.f32 %v2651_v36, %v2650_v50  ;;  %v2315_v63 = vpop.f32.mrb[97].mxu1  ;;  %v1796_v51 = vadd.f32 %v4779_v15, %v3665_v60  ;;  %v2324_v37 = vadd.f32 %v4779_v15, %v3797_v31 }
 0x21f   : > { %v2785_v12 = vadd.f32 %v2784_v4, %v2520_v34  ;;  %v1788_v47 = vadd.f32 %v4779_v15, %v1787_v6  ;;  %v3666_v7 = vpop.f32.mrb[98].mxu0  ;;  %v2316_v11 = vadd.f32 %v4779_v15, %v2315_v63  ;;  %v3798_v21 = vpop.f32.mrb[98].mxu1 }
 0x220   : > { %v1790_v23 = vpop.f32.mrb[99].mxu0  ;;  %v2942_v20 = vadd.f32 %v2941_v57, %v2652_v59  ;;  %v2318_v22 = vpop.f32.mrb[99].mxu1  ;;  %v1799_v48 = vadd.f32 %v4779_v15, %v3666_v7  ;;  %v2327_v54 = vadd.f32 %v4779_v15, %v3798_v21  ;;  %v2524_v36 = vmax.f32 %v1796_v51, 0.0 }
 0x221   : > { %v2786_v17 = vadd.f32 %v2785_v12, %v2521_v0  ;;  %v1791_v25 = vadd.f32 %v4779_v15, %v1790_v23  ;;  %v2654_v29 = vmax.f32 %v2316_v11, 0.0  ;;  %v2522_v46 = vmax.f32 %v1788_v47, 0.0 }
 0x222   : > { %v2943_v41 = vadd.f32 %v2942_v20, %v2653_v8  ;;  %v2319_v55 = vadd.f32 %v4779_v15, %v2318_v22  ;;  %v2525_v57 = vmax.f32 %v1799_v48, 0.0  ;;  %v2656_v0 = vmax.f32 %v2324_v37, 0.0 }
 0x223   : > { %v2787_v50 = vrot.slane %v2786_v17, 4  ;;  %v2523_v28 = vmax.f32 %v1791_v25, 0.0  ;;  %v2657_v22 = vmax.f32 %v2327_v54, 0.0 }
 0x224   : > { %v2944_v39 = vadd.f32 %v2943_v41, %v2654_v29  ;;  %v2655_v60 = vmax.f32 %v2319_v55, 0.0 }
 0x225   : > { %v2788_v59 = vadd.f32 %v2787_v50, %v2786_v17  ;;  %v2793_v34 = vadd.f32 %v2523_v28, %v2522_v46  ;;  %v3669_v4 = vpop.f32.mrb[100].mxu0  ;;  %v3801_v6 = vpop.f32.mrb[100].mxu1 }
 0x226   : > { %v1803_v63 = vpop.f32.mrb[101].mxu0  ;;  %v2331_v31 = vpop.f32.mrb[101].mxu1  ;;  %v2945_v11 = vadd.f32 %v2944_v39, %v2655_v60  ;;  %v1812_v20 = vadd.f32 %v4779_v15, %v3669_v4  ;;  %v2340_v37 = vadd.f32 %v4779_v15, %v3801_v6 }
 0x227   : > { %v2789_v12 = vrot.slane %v2788_v59, 2  ;;  %v2794_v8 = vadd.f32 %v2793_v34, %v2524_v36  ;;  %v1804_v47 = vadd.f32 %v4779_v15, %v1803_v63  ;;  %v3670_v7 = vpop.f32.mrb[102].mxu0  ;;  %v3802_v23 = vpop.f32.mrb[102].mxu1  ;;  %v2332_v50 = vadd.f32 %v4779_v15, %v2331_v31 }
 0x228   : > { %v1806_v21 = vpop.f32.mrb[103].mxu0  ;;  %v2334_v17 = vpop.f32.mrb[103].mxu1  ;;  %v2946_v41 = vadd.f32 %v2945_v11, %v2656_v0  ;;  %v1815_v55 = vadd.f32 %v4779_v15, %v3670_v7  ;;  %v2343_v54 = vadd.f32 %v4779_v15, %v3802_v23  ;;  %v2528_v60 = vmax.f32 %v1812_v20, 0.0 }
 0x229   : > { %v2790_v51 = vadd.f32 %v2789_v12, %v2788_v59  ;;  %v2526_v25 = vmax.f32 %v1804_v47, 0.0  ;;  %v2795_v29 = vadd.f32 %v2794_v8, %v2525_v57  ;;  %v1807_v48 = vadd.f32 %v4779_v15, %v1806_v21 }
 0x22a   : > { %v2658_v36 = vmax.f32 %v2332_v50, 0.0  ;;  %v2947_v34 = vadd.f32 %v2946_v41, %v2657_v22  ;;  %v2335_v59 = vadd.f32 %v4779_v15, %v2334_v17  ;;  %v2660_v6 = vmax.f32 %v2340_v37, 0.0 }
 0x22b   : > { %v2791_v46 = vrot.slane %v2790_v51, 1  ;;  %v2796_v28 = vadd.f32 %v2795_v29, %v2526_v25  ;;  %v2527_v39 = vmax.f32 %v1807_v48, 0.0  ;;  %v2529_v21 = vmax.f32 %v1815_v55, 0.0 }
 0x22c   : > { %v2948_v8 = vadd.f32 %v2947_v34, %v2658_v36  ;;  %v2659_v31 = vmax.f32 %v2335_v59, 0.0 }
 0x22d   : > { %v2792_v4 = vadd.f32 %v2791_v46, %v2790_v51  ;;  %v2797_v57 = vadd.f32 %v2796_v28, %v2527_v39  ;;  %v3673_v63 = vpop.f32.mrb[104].mxu0  ;;  %v3805_v0 = vpop.f32.mrb[104].mxu1  ;;  %v2661_v51 = vmax.f32 %v2343_v54, 0.0 }
 0x22e   : > { %v1819_v12 = vpop.f32.mrb[105].mxu0  ;;  %v2347_v47 = vpop.f32.mrb[105].mxu1  ;;  %v1828_v23 = vadd.f32 %v4779_v15, %v3673_v63  ;;  %v2949_v20 = vadd.f32 %v2948_v8, %v2659_v31  ;;  %v2356_v39 = vadd.f32 %v4779_v15, %v3805_v0 }
 0x22f   : > { %v2981_v11 = vmul.f32 0.00390625, %v2792_v4  ;;  %v2798_v7 = vadd.f32 %v2797_v57, %v2528_v60  ;;  %v1820_v25 = vadd.f32 %v4779_v15, %v1819_v12  ;;  %v3674_v22 = vpop.f32.mrb[106].mxu0  ;;  %v3806_v29 = vpop.f32.mrb[106].mxu1  ;;  %v2348_v48 = vadd.f32 %v4779_v15, %v2347_v47 }
 0x230   : > { %v1822_v17 = vpop.f32.mrb[107].mxu0  ;;  %v2350_v41 = vpop.f32.mrb[107].mxu1  ;;  %v2950_v55 = vadd.f32 %v2949_v20, %v2660_v6  ;;  %v1831_v4 = vadd.f32 %v4779_v15, %v3674_v22  ;;  %v2359_v57 = vadd.f32 %v4779_v15, %v3806_v29  ;;  %v2532_v8 = vmax.f32 %v1828_v23, 0.0 }
 0x231   : > { %v2989_v50 = vpack.c.bf16 %v2981_v11, %v2981_v11  ;;  %v2530_v37 = vmax.f32 %v1820_v25, 0.0  ;;  %v2799_v46 = vadd.f32 %v2798_v7, %v2529_v21  ;;  %v1823_v28 = vadd.f32 %v4779_v15, %v1822_v17 }
 0x232   : > { %v2662_v36 = vmax.f32 %v2348_v48, 0.0  ;;  %v2951_v54 = vadd.f32 %v2950_v55, %v2661_v51  ;;  %v2351_v63 = vadd.f32 %v4779_v15, %v2350_v41  ;;  %v2664_v0 = vmax.f32 %v2356_v39, 0.0 }
 0x233   : > { %v3028_v34 = vunpack.c.l.b16 %v2989_v50  ;;  %v2800_v59 = vadd.f32 %v2799_v46, %v2530_v37  ;;  %v2531_v60 = vmax.f32 %v1823_v28, 0.0  ;;  %v2533_v17 = vmax.f32 %v1831_v4, 0.0 }
 0x234   : > { %v2952_v21 = vadd.f32 %v2951_v54, %v2662_v36  ;;  %v2663_v7 = vmax.f32 %v2351_v63, 0.0 }
 0x235   : > { %v4870_v12 = vsel %vm3036_vm2, %v3028_v34, %v4798_v53  ;;  %v2801_v31 = vadd.f32 %v2800_v59, %v2531_v60  ;;  %v3677_v47 = vpop.f32.mrb[108].mxu0  ;;  %v3809_v6 = vpop.f32.mrb[108].mxu1  ;;  %v2665_v53 = vmax.f32 %v2359_v57, 0.0 }
 0x236   : > { %v1835_v11 = vpop.f32.mrb[109].mxu0  ;;  %v2363_v25 = vpop.f32.mrb[109].mxu1  ;;  %v2953_v50 = vadd.f32 %v2952_v21, %v2663_v7  ;;  %v1844_v37 = vadd.f32 %v4779_v15, %v3677_v47  ;;  %v2372_v36 = vadd.f32 %v4779_v15, %v3809_v6 }
 0x237   : > { %v2802_v22 = vadd.f32 %v2801_v31, %v2532_v8  ;;  %v1836_v51 = vadd.f32 %v4779_v15, %v1835_v11  ;;  %v3678_v20 = vpop.f32.mrb[110].mxu0  ;;  %v2364_v29 = vadd.f32 %v4779_v15, %v2363_v25  ;;  %v3810_v48 = vpop.f32.mrb[110].mxu1 }
 0x238   : > { %v1838_v41 = vpop.f32.mrb[111].mxu0  ;;  %v2366_v23 = vpop.f32.mrb[111].mxu1  ;;  %v2954_v39 = vadd.f32 %v2953_v50, %v2664_v0  ;;  %v1847_v60 = vadd.f32 %v4779_v15, %v3678_v20  ;;  %v2375_v57 = vadd.f32 %v4779_v15, %v3810_v48  ;;  %v2536_v31 = vmax.f32 %v1844_v37, 0.0 }
 0x239   : > { %v2534_v46 = vmax.f32 %v1836_v51, 0.0  ;;  %v2803_v28 = vadd.f32 %v2802_v22, %v2533_v17  ;;  %v1839_v55 = vadd.f32 %v4779_v15, %v1838_v41  ;;  %v2666_v34 = vmax.f32 %v2364_v29, 0.0 }
 0x23a   : > { %v2367_v59 = vadd.f32 %v4779_v15, %v2366_v23  ;;  %v2955_v63 = vadd.f32 %v2954_v39, %v2665_v53  ;;  %v2668_v25 = vmax.f32 %v2372_v36, 0.0  ;;  %v2537_v6 = vmax.f32 %v1847_v60, 0.0 }
 0x23b   : > { %v2804_v4 = vadd.f32 %v2803_v28, %v2534_v46  ;;  %v2535_v54 = vmax.f32 %v1839_v55, 0.0  ;;  %v2669_v50 = vmax.f32 %v2375_v57, 0.0 }
 0x23c   : > { %v2667_v8 = vmax.f32 %v2367_v59, 0.0  ;;  %v2956_v0 = vadd.f32 %v2955_v63, %v2666_v34 }
 0x23d   : > { %v2805_v47 = vadd.f32 %v2804_v4, %v2535_v54  ;;  %v3681_v11 = vpop.f32.mrb[112].mxu0  ;;  %v3813_v21 = vpop.f32.mrb[112].mxu1 }
 0x23e   : > { %v1851_v7 = vpop.f32.mrb[113].mxu0  ;;  %v2379_v17 = vpop.f32.mrb[113].mxu1  ;;  %v2957_v48 = vadd.f32 %v2956_v0, %v2667_v8  ;;  %v1860_v37 = vadd.f32 %v4779_v15, %v3681_v11  ;;  %v2388_v36 = vadd.f32 %v4779_v15, %v3813_v21 }
 0x23f   : > { %v2806_v22 = vadd.f32 %v2805_v47, %v2536_v31  ;;  %v1852_v51 = vadd.f32 %v4779_v15, %v1851_v7  ;;  %v3682_v29 = vpop.f32.mrb[114].mxu0  ;;  %v2380_v20 = vadd.f32 %v4779_v15, %v2379_v17  ;;  %v3814_v41 = vpop.f32.mrb[114].mxu1 }
 0x240   : > { %v1854_v53 = vpop.f32.mrb[115].mxu0  ;;  %v2382_v23 = vpop.f32.mrb[115].mxu1  ;;  %v2958_v39 = vadd.f32 %v2957_v48, %v2668_v25  ;;  %v1863_v60 = vadd.f32 %v4779_v15, %v3682_v29  ;;  %v2391_v57 = vadd.f32 %v4779_v15, %v3814_v41  ;;  %v2540_v31 = vmax.f32 %v1860_v37, 0.0 }
 0x241   : > { %v2538_v46 = vmax.f32 %v1852_v51, 0.0  ;;  %v2807_v28 = vadd.f32 %v2806_v22, %v2537_v6  ;;  %v1855_v55 = vadd.f32 %v4779_v15, %v1854_v53  ;;  %v2670_v34 = vmax.f32 %v2380_v20, 0.0 }
 0x242   : > { %v2383_v59 = vadd.f32 %v4779_v15, %v2382_v23  ;;  %v2959_v63 = vadd.f32 %v2958_v39, %v2669_v50  ;;  %v2672_v17 = vmax.f32 %v2388_v36, 0.0  ;;  %v2541_v21 = vmax.f32 %v1863_v60, 0.0 }
 0x243   : > { %v2808_v4 = vadd.f32 %v2807_v28, %v2538_v46  ;;  %v2539_v54 = vmax.f32 %v1855_v55, 0.0  ;;  %v2673_v48 = vmax.f32 %v2391_v57, 0.0 }
 0x244   : > { %v2671_v8 = vmax.f32 %v2383_v59, 0.0  ;;  %v2960_v25 = vadd.f32 %v2959_v63, %v2670_v34 }
 0x245   : > { %v2809_v47 = vadd.f32 %v2808_v4, %v2539_v54  ;;  %v3685_v11 = vpop.f32.mrb[116].mxu0  ;;  %v3817_v7 = vpop.f32.mrb[116].mxu1 }
 0x246   : > { %v1867_v0 = vpop.f32.mrb[117].mxu0  ;;  %v2395_v6 = vpop.f32.mrb[117].mxu1  ;;  %v2961_v41 = vadd.f32 %v2960_v25, %v2671_v8  ;;  %v1876_v37 = vadd.f32 %v4779_v15, %v3685_v11  ;;  %v2404_v36 = vadd.f32 %v4779_v15, %v3817_v7 }
 0x247   : > { %v2810_v22 = vadd.f32 %v2809_v47, %v2540_v31  ;;  %v1868_v51 = vadd.f32 %v4779_v15, %v1867_v0  ;;  %v3686_v20 = vpop.f32.mrb[118].mxu0  ;;  %v2396_v29 = vadd.f32 %v4779_v15, %v2395_v6  ;;  %v3818_v53 = vpop.f32.mrb[118].mxu1 }
 0x248   : > { %v1870_v50 = vpop.f32.mrb[119].mxu0  ;;  %v2398_v23 = vpop.f32.mrb[119].mxu1  ;;  %v2962_v39 = vadd.f32 %v2961_v41, %v2672_v17  ;;  %v1879_v60 = vadd.f32 %v4779_v15, %v3686_v20  ;;  %v2407_v57 = vadd.f32 %v4779_v15, %v3818_v53  ;;  %v2544_v31 = vmax.f32 %v1876_v37, 0.0 }
 0x249   : > { %v2542_v46 = vmax.f32 %v1868_v51, 0.0  ;;  %v2811_v28 = vadd.f32 %v2810_v22, %v2541_v21  ;;  %v1871_v55 = vadd.f32 %v4779_v15, %v1870_v50  ;;  %v2674_v34 = vmax.f32 %v2396_v29, 0.0 }
 0x24a   : > { %v2399_v59 = vadd.f32 %v4779_v15, %v2398_v23  ;;  %v2963_v63 = vadd.f32 %v2962_v39, %v2673_v48  ;;  %v2676_v6 = vmax.f32 %v2404_v36, 0.0  ;;  %v2545_v7 = vmax.f32 %v1879_v60, 0.0 }
 0x24b   : > { %v2812_v4 = vadd.f32 %v2811_v28, %v2542_v46  ;;  %v2543_v54 = vmax.f32 %v1871_v55, 0.0  ;;  %v2677_v41 = vmax.f32 %v2407_v57, 0.0 }
 0x24c   : > { %v2675_v8 = vmax.f32 %v2399_v59, 0.0  ;;  %v2964_v17 = vadd.f32 %v2963_v63, %v2674_v34 }
 0x24d   : > { %v2813_v47 = vadd.f32 %v2812_v4, %v2543_v54  ;;  %v3689_v11 = vpop.f32.mrb[120].mxu0  ;;  %v3821_v0 = vpop.f32.mrb[120].mxu1 }
 0x24e   : > { %v1883_v25 = vpop.f32.mrb[121].mxu0  ;;  %v2411_v21 = vpop.f32.mrb[121].mxu1  ;;  %v2965_v53 = vadd.f32 %v2964_v17, %v2675_v8  ;;  %v1892_v37 = vadd.f32 %v4779_v15, %v3689_v11  ;;  %v2420_v36 = vadd.f32 %v4779_v15, %v3821_v0 }
 0x24f   : > { %v2814_v22 = vadd.f32 %v2813_v47, %v2544_v31  ;;  %v1884_v51 = vadd.f32 %v4779_v15, %v1883_v25  ;;  %v3690_v29 = vpop.f32.mrb[122].mxu0  ;;  %v2412_v20 = vadd.f32 %v4779_v15, %v2411_v21  ;;  %v3822_v50 = vpop.f32.mrb[122].mxu1 }
 0x250   : > { %v1886_v48 = vpop.f32.mrb[123].mxu0  ;;  %v2414_v23 = vpop.f32.mrb[123].mxu1  ;;  %v2966_v39 = vadd.f32 %v2965_v53, %v2676_v6  ;;  %v1895_v60 = vadd.f32 %v4779_v15, %v3690_v29  ;;  %v2423_v57 = vadd.f32 %v4779_v15, %v3822_v50  ;;  %v2548_v31 = vmax.f32 %v1892_v37, 0.0 }
 0x251   : > { %v2546_v46 = vmax.f32 %v1884_v51, 0.0  ;;  %v2815_v28 = vadd.f32 %v2814_v22, %v2545_v7  ;;  %v1887_v55 = vadd.f32 %v4779_v15, %v1886_v48  ;;  %v2678_v34 = vmax.f32 %v2412_v20, 0.0 }
 0x252   : > { %v2415_v59 = vadd.f32 %v4779_v15, %v2414_v23  ;;  %v2967_v63 = vadd.f32 %v2966_v39, %v2677_v41  ;;  %v2680_v17 = vmax.f32 %v2420_v36, 0.0  ;;  %v2549_v6 = vmax.f32 %v1895_v60, 0.0 }
 0x253   : > { %v2816_v4 = vadd.f32 %v2815_v28, %v2546_v46  ;;  %v2547_v54 = vmax.f32 %v1887_v55, 0.0  ;;  %v2681_v20 = vmax.f32 %v2423_v57, 0.0 }
 0x254   : > { %v2679_v8 = vmax.f32 %v2415_v59, 0.0  ;;  %v2968_v21 = vadd.f32 %v2967_v63, %v2678_v34 }
 0x255   : > { %v2817_v47 = vadd.f32 %v2816_v4, %v2547_v54  ;;  %v3693_v11 = vpop.f32.mrb[124].mxu0 }
 0x256   : > { %v1899_v25 = vpop.f32.mrb[125].mxu0  ;;  %v2969_v48 = vadd.f32 %v2968_v21, %v2679_v8  ;;  %v1908_v29 = vadd.f32 %v4779_v15, %v3693_v11 }
 0x257   : > { %v2818_v7 = vadd.f32 %v2817_v47, %v2548_v31  ;;  %v1900_v0 = vadd.f32 %v4779_v15, %v1899_v25  ;;  %v3694_v22 = vpop.f32.mrb[126].mxu0 }
 0x258   : > { %v1902_v51 = vpop.f32.mrb[127].mxu0  ;;  %v2970_v23 = vadd.f32 %v2969_v48, %v2680_v17  ;;  %v1911_v46 = vadd.f32 %v4779_v15, %v3694_v22  ;;  %v2552_v39 = vmax.f32 %v1908_v29, 0.0 }
 0x259   : > { %v2550_v41 = vmax.f32 %v1900_v0, 0.0  ;;  %v2819_v53 = vadd.f32 %v2818_v7, %v2549_v6  ;;  %v1903_v50 = vadd.f32 %v4779_v15, %v1902_v51  ;;  %v1932_v6 = vadd.f32 %v4779_v15, %v4588_v62 }
 0x25a   : > { %v4908_v55 = vadd.f32 %v2970_v23, %v2681_v20  ;;  %v2553_v4 = vmax.f32 %v1911_v46, 0.0  ;;  %v1935_v51 = vadd.f32 %v4779_v15, %v4595_v5 }
 0x25b   : > { %v2820_v37 = vadd.f32 %v2819_v53, %v2550_v41  ;;  %v2551_v28 = vmax.f32 %v1903_v50, 0.0  ;;  %v4921_v41 = vld [vmem:[%s5039_s2] ss:$0 sm:$0xff]  ;;  %v2558_v50 = vmax.f32 %v1932_v6, 0.0 }
 0x25c   : > { %v1940_v53 = vadd.f32 %v4921_v41, %v4584_v58  ;;  %v2559_v46 = vmax.f32 %v1935_v51, 0.0 }
 0x25d   : > { %v2821_v36 = vadd.f32 %v2820_v37, %v2551_v28  ;;  %v3697_v34 = vpop.f32.mrb[128].mxu0  ;;  %v1943_v37 = vadd.f32 %v4921_v41, %v4592_v2 }
 0x25e   : > { %v1915_v59 = vpop.f32.mrb[129].mxu0  ;;  %v1924_v31 = vadd.f32 %v4779_v15, %v3697_v34 }
 0x25f   : > { %v2822_v60 = vadd.f32 %v2821_v36, %v2552_v39  ;;  %v1916_v54 = vadd.f32 %v4779_v15, %v1915_v59  ;;  %v3698_v63 = vpop.f32.mrb[130].mxu0  ;;  %v1948_v39 = vadd.f32 %v4921_v41, %v4604_v18  ;;  %v2561_v59 = vmax.f32 %v1943_v37, 0.0 }
 0x260   : > { %v1918_v57 = vpop.f32.mrb[131].mxu0  ;;  %v1927_v17 = vadd.f32 %v4779_v15, %v3698_v63  ;;  %v2556_v0 = vmax.f32 %v1924_v31, 0.0 }
 0x261   : > { %v2823_v8 = vadd.f32 %v2822_v60, %v2553_v4  ;;  %v1919_v47 = vadd.f32 %v4779_v15, %v1918_v57  ;;  %v2554_v25 = vmax.f32 %v1916_v54, 0.0  ;;  %v2560_v15 = vmax.f32 %v1940_v53, 0.0 }
 0x262   : > { %v2557_v48 = vmax.f32 %v1927_v17, 0.0  ;;  %v1951_v4 = vadd.f32 %v4921_v41, %v4611_v27  ;;  %v1956_v54 = vadd.f32 %v4921_v41, %v4600_v14  ;;  %v2562_v63 = vmax.f32 %v1948_v39, 0.0 }
 0x263   : > { %v2824_v11 = vrot.slane %v2823_v8, 4  ;;  %v2555_v21 = vmax.f32 %v1919_v47, 0.0  ;;  %v1967_v14 = vadd.f32 %v4921_v41, %v4627_v52  ;;  %v1983_v52 = vadd.f32 %v4921_v41, %v4642_v19 }
 0x264   : > { %v2563_v31 = vmax.f32 %v1951_v4, 0.0  ;;  %v1999_v19 = vadd.f32 %v4921_v41, %v4657_v45  ;;  %v2015_v45 = vadd.f32 %v4921_v41, %v4670_v13 }
 0x265   : > { %v2825_v7 = vadd.f32 %v2824_v11, %v2823_v8  ;;  %v2830_v22 = vadd.f32 %v2555_v21, %v2554_v25  ;;  %v1959_v8 = vadd.f32 %v4921_v41, %v4608_v24  ;;  %v2564_v11 = vmax.f32 %v1956_v54, 0.0 }
 0x266   : > { %v1964_v25 = vadd.f32 %v4921_v41, %v4620_v42  ;;  %v2567_v51 = vmax.f32 %v1967_v14, 0.0 }
 0x267   : > { %v2826_v20 = vrot.slane %v2825_v7, 2  ;;  %v2831_v29 = vadd.f32 %v2830_v22, %v2556_v0  ;;  %v2565_v21 = vmax.f32 %v1959_v8, 0.0  ;;  %v1975_v22 = vadd.f32 %v4921_v41, %v4624_v49 }
 0x268   : > { %v2566_v24 = vmax.f32 %v1964_v25, 0.0  ;;  %v1991_v49 = vadd.f32 %v4921_v41, %v4640_v16  ;;  %v2007_v16 = vadd.f32 %v4921_v41, %v4655_v43  ;;  %v2023_v43 = vadd.f32 %v4921_v41, %v4668_v10 }
 0x269   : > { %v2827_v23 = vadd.f32 %v2826_v20, %v2825_v7  ;;  %v2832_v62 = vadd.f32 %v2831_v29, %v2557_v48  ;;  %v1972_v7 = vadd.f32 %v4921_v41, %v4616_v38  ;;  %v2569_v29 = vmax.f32 %v1975_v22, 0.0 }
 0x26a   : > { %v1988_v38 = vadd.f32 %v4921_v41, %v4632_v3  ;;  %v2004_v3 = vadd.f32 %v4921_v41, %v4648_v32  ;;  %v2020_v32 = vadd.f32 %v4921_v41, %v4662_v61  ;;  %v2581_v25 = vmax.f32 %v2023_v43, 0.0 }
 0x26b   : > { %v2828_v28 = vrot.slane %v2827_v23, 1  ;;  %v2833_v5 = vadd.f32 %v2832_v62, %v2558_v50  ;;  %v2568_v42 = vmax.f32 %v1972_v7, 0.0  ;;  %v2571_v62 = vmax.f32 %v1983_v52, 0.0 }
 0x26c   : > { %v2576_v4 = vmax.f32 %v2004_v3, 0.0  ;;  %v2031_v61 = vadd.f32 %v4921_v41, %v4683_v44 }
 0x26d   : > { %v2829_v36 = vadd.f32 %v2828_v28, %v2827_v23  ;;  %v2834_v34 = vadd.f32 %v2833_v5, %v2559_v46  ;;  %v2572_v46 = vmax.f32 %v1988_v38, 0.0  ;;  %v2573_v5 = vmax.f32 %v1991_v49, 0.0 }
 0x26f   : > { %v2982_v58 = vmul.f32 0.00390625, %v2829_v36  ;;  %v2835_v60 = vadd.f32 %v2834_v34, %v2560_v15  ;;  %v2575_v34 = vmax.f32 %v1999_v19, 0.0 }
 0x271   : > { %v2990_v2 = vpack.c.bf16 %v2982_v58, %v2982_v58  ;;  %v2836_v57 = vadd.f32 %v2835_v60, %v2561_v59  ;;  %v2577_v60 = vmax.f32 %v2007_v16, 0.0 }
 0x273   : > { %v3029_v18 = vunpack.c.l.b16 %v2990_v2  ;;  %v2837_v47 = vadd.f32 %v2836_v57, %v2562_v63  ;;  %v2579_v57 = vmax.f32 %v2015_v45, 0.0 }
 0x275   : > { %v4938_v27 = vsel %vm3038_vm3, %v3029_v18, %v4870_v12  ;;  %v2838_v17 = vadd.f32 %v2837_v47, %v2563_v31  ;;  %v1980_v12 = vadd.f32 %v4921_v41, %v4636_v9  ;;  %v1996_v9 = vadd.f32 %v4921_v41, %v4651_v35 }
 0x276   : > { %v2012_v35 = vadd.f32 %v4921_v41, %v4665_v1  ;;  %v2898_v31 = vrot.slane %v4766_v26, 4  ;;  %v2580_v18 = vmax.f32 %v2020_v32, 0.0  ;;  %v2028_v1 = vadd.f32 %v4921_v41, %v4678_v33 }
 0x277   : > { %v2839_v6 = vadd.f32 %v2838_v17, %v2564_v11  ;;  %v2570_v50 = vmax.f32 %v1980_v12, 0.0  ;;  %v2574_v39 = vmax.f32 %v1996_v9, 0.0  ;;  %v2935_v47 = vrot.slane %v4843_v56, 4 }
 0x278   : > { %v2578_v63 = vmax.f32 %v2012_v35, 0.0  ;;  %v2972_v11 = vrot.slane %v4908_v55, 4  ;;  %v2899_v10 = vadd.f32 %v2898_v31, %v4766_v26  ;;  %v2582_v14 = vmax.f32 %v2028_v1, 0.0 }
 0x279   : > { %v2840_v0 = vadd.f32 %v2839_v6, %v2565_v21  ;;  %v2036_v21 = vadd.f32 %v4921_v41, %v4676_v30  ;;  %v2936_v6 = vadd.f32 %v2935_v47, %v4843_v56 }
 0x27a   : > { %v2973_v33 = vadd.f32 %v2972_v11, %v4908_v55 }
 0x27b   : > { %v2841_v20 = vadd.f32 %v2840_v0, %v2566_v24  ;;  %v2039_v24 = vadd.f32 %v4921_v41, %v4681_v40  ;;  %v2583_v0 = vmax.f32 %v2031_v61, 0.0  ;;  %v2937_v44 = vrot.slane %v2936_v6, 2 }
 0x27c   : > { %v2974_v12 = vrot.slane %v2973_v33, 2 }
 0x27d   : > { %v2842_v48 = vadd.f32 %v2841_v20, %v2567_v51  ;;  %v2900_v51 = vrot.slane %v2899_v10, 2  ;;  %v2584_v20 = vmax.f32 %v2036_v21, 0.0  ;;  %v2585_v26 = vmax.f32 %v2039_v24, 0.0 }
 0x27e   : > { %v2938_v30 = vadd.f32 %v2937_v44, %v2936_v6 }
 0x27f   : > { %v2843_v53 = vadd.f32 %v2842_v48, %v2568_v42 }
 0x281   : > { %v2844_v23 = vadd.f32 %v2843_v53, %v2569_v29  ;;  %v2901_v29 = vadd.f32 %v2900_v51, %v2899_v10  ;;  %v2975_v53 = vadd.f32 %v2974_v12, %v2973_v33 }
 0x283   : > { %v2845_v37 = vadd.f32 %v2844_v23, %v2570_v50  ;;  %v2902_v38 = vrot.slane %v2901_v29, 1  ;;  %v2939_v50 = vrot.slane %v2938_v30, 1  ;;  %v2976_v23 = vrot.slane %v2975_v53, 1 }
 0x285   : > { %v2846_v28 = vadd.f32 %v2845_v37, %v2571_v62  ;;  %v2903_v40 = vadd.f32 %v2902_v38, %v2901_v29  ;;  %v2940_v41 = vadd.f32 %v2939_v50, %v2938_v30  ;;  %v2977_v37 = vadd.f32 %v2976_v23, %v2975_v53 }
 0x287   : > { %v2847_v15 = vadd.f32 %v2846_v28, %v2572_v46  ;;  %v2984_v9 = vmul.f32 0.00390625, %v2903_v40  ;;  %v2985_v28 = vmul.f32 0.00390625, %v2940_v41  ;;  %v2986_v19 = vmul.f32 0.00390625, %v2977_v37 }
 0x289   : > { %v2848_v36 = vadd.f32 %v2847_v15, %v2573_v5  ;;  %v2992_v3 = vpack.c.bf16 %v2984_v9, %v2984_v9  ;;  %v2994_v16 = vpack.c.bf16 %v2986_v19, %v2986_v19 }
 0x28b   : > { %v2849_v59 = vadd.f32 %v2848_v36, %v2574_v39  ;;  %v2993_v39 = vpack.c.bf16 %v2985_v28, %v2985_v28 }
 0x28d   : > { %v2850_v58 = vadd.f32 %v2849_v59, %v2575_v34  ;;  %v3031_v59 = vunpack.c.l.b16 %v2992_v3 }
 0x28f   : > { %v2851_v54 = vadd.f32 %v2850_v58, %v2576_v4  ;;  %v3032_v4 = vunpack.c.l.b16 %v2993_v39  ;;  %v3033_v58 = vunpack.c.l.b16 %v2994_v16 }
 0x291   : > { %v2852_v2 = vadd.f32 %v2851_v54, %v2577_v60 }
 0x293   : > { %v2853_v8 = vadd.f32 %v2852_v2, %v2578_v63  ;;  %v3392_v63 = vld [vmem:[%s5041_s4] ss:$0 sm:$0xff] }
 0x295   : > { %v2854_v13 = vadd.f32 %v2853_v8, %v2579_v57 }
 0x297   : > { %v2855_v17 = vadd.f32 %v2854_v13, %v2580_v18 }
 0x299   : > { %v2856_v7 = vadd.f32 %v2855_v17, %v2581_v25 }
 0x29b   : > { %v2857_v22 = vadd.f32 %v2856_v7, %v2582_v14 }
 0x29d   : > { %v2858_v42 = vadd.f32 %v2857_v22, %v2583_v0 }
 0x29f   : > { %v2859_v48 = vadd.f32 %v2858_v42, %v2584_v20 }
 0x2a1   : > { %v2860_v52 = vadd.f32 %v2859_v48, %v2585_v26 }
 0x2a3   : > { %v2861_v56 = vrot.slane %v2860_v52, 4 }
 0x2a5   : > { %v2862_v55 = vadd.f32 %v2861_v56, %v2860_v52 }
 0x2a7   : > { %v2863_v49 = vrot.slane %v2862_v55, 2 }
 0x2a9   : > { %v2864_v62 = vadd.f32 %v2863_v49, %v2862_v55 }
 0x2ab   : > { %v2865_v46 = vrot.slane %v2864_v62, 1 }
 0x2ad   : > { %v2866_v5 = vadd.f32 %v2865_v46, %v2864_v62 }
 0x2af   : > { %v2983_v15 = vmul.f32 0.00390625, %v2866_v5 }
 0x2b1   : > { %v2991_v36 = vpack.c.bf16 %v2983_v15, %v2983_v15 }
 0x2b3   : > { %v3030_v34 = vunpack.c.l.b16 %v2991_v36 }
 0x2b5   : > { %v3041_v35 = vsel %vm3040_vm4, %v3030_v34, %v4938_v27 }
 0x2b6   : > { %v3043_v60 = vsel %vm3042_vm5, %v3031_v59, %v3041_v35 }
 0x2b7   : > { %v3045_v45 = vsel %vm3044_vm6, %v3032_v4, %v3043_v60 }
 0x2b8   : > { %v3047_v54 = vsel %vm3046_vm7, %v3033_v58, %v3045_v45 }
 0x2b9   : > { %v3048_v32 = vpack.c.b16 %v3047_v54, %v3047_v54 }
 0x2bb   : > { %3840 = vmatmul.mubr.bf16.vlgmr.msra.gmra.mrb[124].mxu1 %v3048_v32 }
 0x38e   : > { %v3132_v2 = vpop.f32.mrb[124].mxu1 }
 0x38f   : > { %v3133_v43 = vadd.f32 %v3392_v63, %v3132_v2  ;;  %v3841_v27 = vpop.f32.mrb[125].mxu1 }
 0x390   : > { %v3135_v57 = vpop.f32.mrb[126].mxu1 }
 0x391   : > { %3138 = vst [vmem:[%s271_s17] sm:$0xff] %v3133_v43  ;;  %v3842_v8 = vpop.f32.mrb[127].mxu1 }
 0x392   : > { %4175 = shalt.err (!%p4172_p1)
}
 0x393   : > { %s4176_s14 = scalar_lea.hbm %s4993_s9, 128  ;;  %s4180_s12 = scalar_lea.hbm %s5042_s5, 256 }
 0x394   : > { %p4177_p13 = scmp.ne.s32.totalorder %s4993_s9, %s4176_s14  ;;  %p4181_p4 = scmp.lt.u32.totalorder %s4993_s9, %s5042_s5 }
 0x395   : > { %p4182_p5 = scmp.lt.u32.totalorder %s4180_s12, %s4176_s14  ;;  %p4184_p11 = scmp.lt.u32.totalorder %s4176_s14, %s4993_s9 }
 0x396   : > { %p4178_p6 = pnand %p4177_p13, %p5056_p0 }
 0x397   : > { %p4183_p8 = por %p4182_p5, %p4181_p4 }
 0x398   : > { %p4179_p10 = pneg %p4178_p6 }
 0x399   : > { %p4185_p2 = por %p4184_p11, %p4183_p8 }
 0x39b   : > { %p4186_p3 = pnand %p4185_p2, %p4179_p10 }
 0x39d   : > { %4189 = shalt.err (!%p4186_p3)
}
 0x39e   : > { %3869 = dma.vmem_to_hbm [thread:$0]  (%p5056_p0), %s4995_s7, 128, %s4993_s9, %s3140_s24  }
 0x39f PF: > { %s3165_s11 = sand.u32 1, %s4220_s18   ;;  %p5057_p7 = scmp.ne.s32.totalorder %s5047_s25, 0 }
 0x3a0   : > { %p5058_p9 = scmp.ge.s32.totalorder %s4232_s21, 2  ;;  %s3166_s17 = scalar_lea.sflag [#allocation4], %s3165_s11 }
 0x3a2   : > { %p3883_p12 = pnand %p5058_p9, %p5057_p7 }
 0x3a4   : > { %4215 = dma.done.wait (!%p3883_p12), %s3166_s17, 128  }
 0x3a5   : > { %4217 = vsyncadd (!%p3883_p12), %s3166_s17, 4294967168  ;;  %p19_p1 = scmp.ge.s32.totalorder %s4388_s29, 4   ;;  %s5059_s18 = smov %s4224_s19 }
 0x3a6   : > { %s5060_s19 = smov %s4228_s20  ;;  %s5061_s20 = smov %s4404_s27 }
 0x3a7   : > { %s5062_s21 = smov %s4388_s29  ;;  %21 = sbr.rel (!%p19_p1) target bundleno = 6 (0x6), region = 93 }
 0x3ae   :  { %3171 = vsyncpa [#allocation3], 1 }
 0x3af   :  { %3173 = vsyncpa [#allocation3 + $0x1], 1 }
 0x3b0   :  { %3174 = vsyncpa [#allocation6], 1 }
 0x3b1   :  { %3175 = vsyncpa [#allocation4], 1 }
 0x3b2   :  { %3177 = vsyncpa [#allocation4 + $0x1], 1 }

</bundles_post_ra>
